<compile_context>
chip_gen: v7x
topology: tpu7x:2x2x1
jax: 0.10.0
libtpu: 0.0.40
codegen_flags: <defaults>
</compile_context>

<pallas_src>
import numpy as np
import jax
import jax.numpy as jnp
from jax.experimental import pallas as pl
from jax.experimental.pallas import tpu as pltpu

_EPS = 1e-6
_TAP_OFFSETS = tuple((oy, ox) for oy in (-1, 0, 1) for ox in (-1, 0, 1))
_CENTER_TAP = 4


# ----------------------------------------------------------------------------
# Host-side helpers: tap masks + parameter folding / packing.
# ----------------------------------------------------------------------------
def _tap_masks_np(H, W):
    """(9, H*W) f32 validity masks for the 9 taps of a 3x3 conv, zero pad=1."""
    m = np.ones((9, H, W), np.float32)
    for t, (oy, ox) in enumerate(_TAP_OFFSETS):
        if oy == -1:
            m[t, 0, :] = 0.0
        elif oy == 1:
            m[t, H - 1, :] = 0.0
        if ox == -1:
            m[t, :, 0] = 0.0
        elif ox == 1:
            m[t, :, W - 1] = 0.0
    return m.reshape(9, H * W)


def _pack_params(p, C, COUT):
    """Fold LN affine -> conv1/conv4, beta/gamma -> conv3/conv5, split the
    DW-expanded convs into SimpleGate halves, and pack everything into one
    column-vector slab and one right-padded matrix slab (+ offset tables)."""
    f32 = jnp.float32
    a = lambda n: jnp.asarray(p[n], f32)

    n1w, n1b, n2w, n2b = a('n1w'), a('n1b'), a('n2w'), a('n2b')
    beta, gamma = a('beta').reshape(-1), a('gamma').reshape(-1)
    c1w, c1b = a('c1w'), a('c1b')
    c3w, c3b = a('c3w'), a('c3b')
    c4w, c4b = a('c4w'), a('c4b')
    c5w, c5b = a('c5w'), a('c5b')
    scaw, scab = a('scaw'), a('scab')
    dww, dwb = a('dww').reshape(2 * C, 9), a('dwb')
    endw, endb = a('endw'), a('endb')

    # Host-side reparameterization (zero runtime cost).
    c1w_f = c1w * n1w[None, :]           # fold norm1 affine into conv1
    c1b_f = c1b + c1w @ n1b
    c4w_f = c4w * n2w[None, :]           # fold norm2 affine into conv4
    c4b_f = c4b + c4w @ n2b
    c3w_f = beta[:, None] * c3w          # fold beta into conv3
    c3b_f = beta * c3b
    c5w_f = gamma[:, None] * c5w         # fold gamma into conv5
    c5b_f = gamma * c5b
    # end conv: 9 stacked per-tap (Cout, C) matrices (tap order = _TAP_OFFSETS)
    end_stack = jnp.transpose(endw, (2, 3, 0, 1)).reshape(9 * COUT, C)

    vecs = [
        ('c1ba', c1b_f[:C]), ('c1bb', c1b_f[C:]),
        ('dwba', dwb[:C]), ('dwbb', dwb[C:]),
        ('scab', scab), ('c3b', c3b_f),
        ('c4ba', c4b_f[:C]), ('c4bb', c4b_f[C:]),
        ('c5b', c5b_f), ('endb', endb),
    ]
    mats = [
        ('c1wa', c1w_f[:C]), ('c1wb', c1w_f[C:]),
        ('dwwa', dww[:C]), ('dwwb', dww[C:]),
        ('scaw', scaw), ('c3w', c3w_f),
        ('c4wa', c4w_f[:C]), ('c4wb', c4w_f[C:]),
        ('c5w', c5w_f), ('endw', end_stack),
    ]

    vec_parts, vec_ofs, off = [], {}, 0
    for name, v in vecs:
        v = v.reshape(-1, 1)
        vec_ofs[name] = (off, int(v.shape[0]))
        vec_parts.append(v)
        off += int(v.shape[0])
    vec_slab = jnp.concatenate(vec_parts, axis=0)

    maxcol = max(int(m.shape[1]) for _, m in mats)
    mat_parts, mat_ofs, off = [], {}, 0
    for name, m in mats:
        r, c = int(m.shape[0]), int(m.shape[1])
        mat_ofs[name] = (off, r, c)
        mat_parts.append(jnp.pad(m, ((0, 0), (0, maxcol - c))))
        off += r
    mat_slab = jnp.concatenate(mat_parts, axis=0)
    return vec_slab, mat_slab, vec_ofs, mat_ofs


# ----------------------------------------------------------------------------
# Pallas kernel: full NAFBlock + end 3x3 conv for one image (channel-major).
# ----------------------------------------------------------------------------
def _make_kernel(C, COUT, H, W, vec_ofs, mat_ofs):
    HW = H * W

    def kernel(x_ref, vec_ref, mat_ref, mask_ref, o_ref):
        def vec(name):
            o, n = vec_ofs[name]
            return vec_ref[o:o + n, :]                     # (n, 1)

        def mat(name):
            o, r, c = mat_ofs[name]
            return mat_ref[o:o + r, 0:c]                   # (r, c)

        def layer_norm(z):
            # var = E[z^2] - mu^2: two independent sublane reductions (pipeline).
            mu = jnp.mean(z, axis=0, keepdims=True)
            ex2 = jnp.mean(z * z, axis=0, keepdims=True)
            var = jnp.maximum(ex2 - mu * mu, 0.0)
            return (z - mu) * jax.lax.rsqrt(var + _EPS)

        def shifted(z, t, oy, ox):
            # One 3x3 tap: XLU lane rotation + precomputed border mask (zero pad).
            s = oy * W + ox
            return pltpu.roll(z, (-s) % HW, axis=1) * mask_ref[t:t + 1, :]

        x = x_ref[0]                                       # (C, HW), lane-dense

        # ---------------- spatial branch: LN (affine folded) + conv1 halves --
        xn = layer_norm(x)
        ha = jnp.dot(mat('c1wa'), xn, preferred_element_type=jnp.float32) + vec('c1ba')
        hb = jnp.dot(mat('c1wb'), xn, preferred_element_type=jnp.float32) + vec('c1bb')

        # depthwise 3x3 (pad=1): fused roll -> mask -> FMA per tap, per half
        dwwa, dwwb = mat('dwwa'), mat('dwwb')              # (C, 9) each, loaded once
        acc_a = ha * dwwa[:, _CENTER_TAP:_CENTER_TAP + 1] + vec('dwba')
        acc_b = hb * dwwb[:, _CENTER_TAP:_CENTER_TAP + 1] + vec('dwbb')
        for t, (oy, ox) in enumerate(_TAP_OFFSETS):
            if t == _CENTER_TAP:
                continue
            acc_a = acc_a + shifted(ha, t, oy, ox) * dwwa[:, t:t + 1]
            acc_b = acc_b + shifted(hb, t, oy, ox) * dwwb[:, t:t + 1]

        # SimpleGate (halves kept separate -> no sub-tile sublane split)
        g = acc_a * acc_b                                  # (C, HW)

        # Simplified channel attention: pool FIRST, then (C,C)@(C,1) matvec.
        pooled = jnp.mean(g, axis=1, keepdims=True)        # (C, 1)
        att = jnp.dot(mat('scaw'), pooled, preferred_element_type=jnp.float32) + vec('scab')
        g = g * att

        # conv3 (beta folded) + residual
        y = x + jnp.dot(mat('c3w'), g, preferred_element_type=jnp.float32) + vec('c3b')

        # ---------------- FFN branch: LN (affine folded) + conv4 halves ------
        yn = layer_norm(y)
        fa = jnp.dot(mat('c4wa'), yn, preferred_element_type=jnp.float32) + vec('c4ba')
        fb = jnp.dot(mat('c4wb'), yn, preferred_element_type=jnp.float32) + vec('c4bb')
        g2 = fa * fb                                       # SimpleGate
        y = y + jnp.dot(mat('c5w'), g2, preferred_element_type=jnp.float32) + vec('c5b')

        # ---------------- end: 3x3 conv C -> Cout, 9 accumulated matmuls -----
        ew = mat('endw')                                   # (9*COUT, C), loaded once
        acc = jnp.dot(ew[_CENTER_TAP * COUT:(_CENTER_TAP + 1) * COUT, :], y,
                      preferred_element_type=jnp.float32)
        for t, (oy, ox) in enumerate(_TAP_OFFSETS):
            if t == _CENTER_TAP:
                continue
            acc = acc + jnp.dot(ew[t * COUT:(t + 1) * COUT, :],
                                shifted(y, t, oy, ox),
                                preferred_element_type=jnp.float32)
        o_ref[0] = (acc + vec('endb')).astype(o_ref.dtype)

    return kernel


# ----------------------------------------------------------------------------
# Wrapper: NCHW in / NCHW out (spatial dims flattened only; no transposes).
# ----------------------------------------------------------------------------
def end_conv_forward(x_nchw, params):
    B, C, H, W = x_nchw.shape
    COUT = int(params['endb'].shape[0])
    HW = H * W

    x_flat = x_nchw.reshape(B, C, HW).astype(jnp.float32)
    vec_slab, mat_slab, vec_ofs, mat_ofs = _pack_params(params, C, COUT)
    tapmask = jnp.asarray(_tap_masks_np(H, W))             # (9, HW)

    kernel = _make_kernel(C, COUT, H, W, vec_ofs, mat_ofs)

    # TODO(synk): for production NAFNet sizes add a spatial row-tile grid axis
    # (1-row halo, two-pass SCA pooling) and bf16 activation I/O on v6e/v7x,
    # plus pl.Buffered(1) on the three constant-index operands; at this test
    # size a whole image per grid step fits easily and grid=(B,) already gives
    # a >=2-wide parallel axis for v7x's two TensorCores.
    out = pl.pallas_call(
        kernel,
        out_shape=jax.ShapeDtypeStruct((B, COUT, HW), jnp.float32),
        grid=(B,),
        in_specs=[
            pl.BlockSpec((1, C, HW), lambda b: (b, 0, 0)),
            pl.BlockSpec(vec_slab.shape, lambda b: (0, 0)),
            pl.BlockSpec(mat_slab.shape, lambda b: (0, 0)),
            pl.BlockSpec(tapmask.shape, lambda b: (0, 0)),
        ],
        out_specs=pl.BlockSpec((1, COUT, HW), lambda b: (b, 0, 0)),
        compiler_params=pltpu.CompilerParams(
            dimension_semantics=("parallel",),
            vmem_limit_bytes=32 * 1024 * 1024,
        ),
    )(x_flat, vec_slab, mat_slab, tapmask)

    return out.reshape(B, COUT, H, W)


# ----------------------------------------------------------------------------
# Deterministic parameter init (natural PyTorch-like shapes).
# ----------------------------------------------------------------------------
def init_params(key, c, cout):
    dw = 2 * c
    shapes = {
        'n1w': (c,), 'n1b': (c,),
        'c1w': (dw, c), 'c1b': (dw,),
        'dww': (dw, 3, 3), 'dwb': (dw,),
        'scaw': (c, c), 'scab': (c,),
        'c3w': (c, c), 'c3b': (c,),
        'beta': (c,), 'gamma': (c,),
        'n2w': (c,), 'n2b': (c,),
        'c4w': (dw, c), 'c4b': (dw,),
        'c5w': (c, c), 'c5b': (c,),
        'endw': (cout, c, 3, 3), 'endb': (cout,),
    }
    keys = jax.random.split(key, len(shapes))
    params = {}
    for (name, shape), k in zip(shapes.items(), keys):
        params[name] = 0.2 * jax.random.normal(k, shape, jnp.float32)
    # LayerNorm affine weights start near 1 (PyTorch default is exactly 1).
    params['n1w'] = params['n1w'] + 1.0
    params['n2w'] = params['n2w'] + 1.0
    return params


# ----------------------------------------------------------------------------
# Pure-JAX reference (NCHW, explicit padding) for a correctness check.
# ----------------------------------------------------------------------------
def reference_forward(x, p):
    x = jnp.asarray(x, jnp.float32)
    B, C, H, W = x.shape
    HI = jax.lax.Precision.HIGHEST

    def ln(z, w, b):
        mu = jnp.mean(z, axis=1, keepdims=True)
        var = jnp.mean((z - mu) ** 2, axis=1, keepdims=True)
        return ((z - mu) / jnp.sqrt(var + _EPS) * w[None, :, None, None]
                + b[None, :, None, None])

    def conv1x1(z, w, b):
        return (jnp.einsum('bchw,oc->bohw', z, w, precision=HI)
                + b[None, :, None, None])

    def dwconv3x3(z, w, b):
        zp = jnp.pad(z, ((0, 0), (0, 0), (1, 1), (1, 1)))
        out = jnp.zeros_like(z)
        for dy in range(3):
            for dx in range(3):
                out = out + zp[:, :, dy:dy + H, dx:dx + W] * w[:, dy, dx][None, :, None, None]
        return out + b[None, :, None, None]

    def conv3x3(z, w, b):
        zp = jnp.pad(z, ((0, 0), (0, 0), (1, 1), (1, 1)))
        out = jnp.zeros((z.shape[0], w.shape[0], H, W), jnp.float32) + b[None, :, None, None]
        for dy in range(3):
            for dx in range(3):
                out = out + jnp.einsum('bchw,oc->bohw', zp[:, :, dy:dy + H, dx:dx + W],
                                       w[:, :, dy, dx], precision=HI)
        return out

    inp = x
    h = ln(inp, p['n1w'], p['n1b'])
    h = conv1x1(h, p['c1w'], p['c1b'])
    h = dwconv3x3(h, p['dww'], p['dwb'])
    h = h[:, :C] * h[:, C:]
    pooled = jnp.mean(h, axis=(2, 3), keepdims=True)
    att = conv1x1(pooled, p['scaw'], p['scab'])
    h = h * att
    h = conv1x1(h, p['c3w'], p['c3b'])
    y = inp + h * p['beta'][None, :, None, None]
    h = ln(y, p['n2w'], p['n2b'])
    h = conv1x1(h, p['c4w'], p['c4b'])
    h = h[:, :C] * h[:, C:]
    h = conv1x1(h, p['c5w'], p['c5b'])
    y = y + h * p['gamma'][None, :, None, None]
    return conv3x3(y, p['endw'], p['endb'])


if __name__ == "__main__":
    B, C_IN, C_OUT, H, W = 2, 4, 8, 16, 16

    key = jax.random.PRNGKey(0)
    kx, kp = jax.random.split(key)
    x = jax.random.normal(kx, (B, C_IN, H, W), jnp.float32)   # NCHW like PyTorch
    params = init_params(kp, C_IN, C_OUT)

    out = jax.block_until_ready(end_conv_forward(x, params))
    assert out.shape == (B, C_OUT, H, W), out.shape

    ref = jax.block_until_ready(reference_forward(x, params))
    np.testing.assert_allclose(np.asarray(out), np.asarray(ref), rtol=2e-3, atol=2e-3)

    print("KERNEL_OK")
</pallas_src>

<mosaic_0001>
module attributes {stable_mosaic.version = 11 : i64} {
  func.func @kernel(%arg0: i32, %arg1: memref<1x4x256xf32, #tpu.memory_space<vmem>>, %arg2: memref<44x1xf32, #tpu.memory_space<vmem>>, %arg3: memref<108x9xf32, #tpu.memory_space<vmem>>, %arg4: memref<9x256xf32, #tpu.memory_space<vmem>>, %arg5: memref<1x8x256xf32, #tpu.memory_space<vmem>>) attributes {dimension_semantics = [#tpu.dimension_semantics<parallel>], iteration_bounds = array<i64: 2>, scalar_prefetch = 0 : i64, scratch_operands = 0 : i64, tpu.core_type = #tpu.core_type<tc>, window_params = [{transform_indices = @transform_0, window_bounds = array<i64: 1, 4, 256>}, {pipeline_mode = #tpu.pipeline_mode<synchronous>, transform_indices = @transform_1, window_bounds = array<i64: 44, 1>}, {pipeline_mode = #tpu.pipeline_mode<synchronous>, transform_indices = @transform_2, window_bounds = array<i64: 108, 9>}, {pipeline_mode = #tpu.pipeline_mode<synchronous>, transform_indices = @transform_3, window_bounds = array<i64: 9, 256>}, {transform_indices = @transform_4, window_bounds = array<i64: 1, 8, 256>}]} {
    %c0 = arith.constant 0 : index
    %c0_0 = arith.constant 0 : index
    %c0_1 = arith.constant 0 : index
    %0 = vector.load %arg1[%c0, %c0_0, %c0_1] : memref<1x4x256xf32, #tpu.memory_space<vmem>>, vector<1x4x256xf32>
    %1 = vector.shape_cast %0 : vector<1x4x256xf32> to vector<4x256xf32>
    %cst = arith.constant dense<0.000000e+00> : vector<256xf32>
    %2 = vector.multi_reduction <add>, %1, %cst [0] : vector<4x256xf32> to vector<256xf32>
    %3 = vector.shape_cast %2 : vector<256xf32> to vector<1x256xf32>
    %cst_2 = arith.constant 4.000000e+00 : f32
    %4 = vector.broadcast %cst_2 : f32 to vector<1x256xf32>
    %5 = arith.divf %3, %4 : vector<1x256xf32>
    %6 = arith.mulf %1, %1 : vector<4x256xf32>
    %cst_3 = arith.constant dense<0.000000e+00> : vector<256xf32>
    %7 = vector.multi_reduction <add>, %6, %cst_3 [0] : vector<4x256xf32> to vector<256xf32>
    %8 = vector.shape_cast %7 : vector<256xf32> to vector<1x256xf32>
    %cst_4 = arith.constant 4.000000e+00 : f32
    %9 = vector.broadcast %cst_4 : f32 to vector<1x256xf32>
    %10 = arith.divf %8, %9 : vector<1x256xf32>
    %11 = arith.mulf %5, %5 : vector<1x256xf32>
    %12 = arith.subf %10, %11 : vector<1x256xf32>
    %cst_5 = arith.constant 0.000000e+00 : f32
    %13 = vector.broadcast %cst_5 : f32 to vector<1x256xf32>
    %14 = arith.maximumf %12, %13 : vector<1x256xf32>
    %15 = vector.broadcast %5 : vector<1x256xf32> to vector<4x256xf32>
    %16 = arith.subf %1, %15 : vector<4x256xf32>
    %cst_6 = arith.constant 9.99999997E-7 : f32
    %17 = vector.broadcast %cst_6 : f32 to vector<1x256xf32>
    %18 = arith.addf %14, %17 : vector<1x256xf32>
    %19 = math.rsqrt %18 : vector<1x256xf32>
    %20 = vector.broadcast %19 : vector<1x256xf32> to vector<4x256xf32>
    %21 = arith.mulf %16, %20 : vector<4x256xf32>
    %c0_7 = arith.constant 0 : index
    %c0_8 = arith.constant 0 : index
    %22 = vector.load %arg3[%c0_7, %c0_8] : memref<108x9xf32, #tpu.memory_space<vmem>>, vector<4x4xf32>
    %cst_9 = arith.constant dense<0.000000e+00> : vector<4x256xf32>
    %23 = tpu.matmul %22, %21, %cst_9 {dimension_numbers = #tpu.dot_dimension_numbers<[1], [0], [0], [1], [0, 0, 1, 1], [], []>} : vector<4x4xf32>, vector<4x256xf32>, vector<4x256xf32> -> vector<4x256xf32>
    %c0_10 = arith.constant 0 : index
    %c0_11 = arith.constant 0 : index
    %24 = vector.load %arg2[%c0_10, %c0_11] : memref<44x1xf32, #tpu.memory_space<vmem>>, vector<4x1xf32>
    %25 = vector.broadcast %24 : vector<4x1xf32> to vector<4x256xf32>
    %26 = arith.addf %23, %25 : vector<4x256xf32>
    %c4 = arith.constant 4 : index
    %c0_12 = arith.constant 0 : index
    %27 = vector.load %arg3[%c4, %c0_12] : memref<108x9xf32, #tpu.memory_space<vmem>>, vector<4x4xf32>
    %cst_13 = arith.constant dense<0.000000e+00> : vector<4x256xf32>
    %28 = tpu.matmul %27, %21, %cst_13 {dimension_numbers = #tpu.dot_dimension_numbers<[1], [0], [0], [1], [0, 0, 1, 1], [], []>} : vector<4x4xf32>, vector<4x256xf32>, vector<4x256xf32> -> vector<4x256xf32>
    %c4_14 = arith.constant 4 : index
    %c0_15 = arith.constant 0 : index
    %29 = vector.load %arg2[%c4_14, %c0_15] : memref<44x1xf32, #tpu.memory_space<vmem>>, vector<4x1xf32>
    %30 = vector.broadcast %29 : vector<4x1xf32> to vector<4x256xf32>
    %31 = arith.addf %28, %30 : vector<4x256xf32>
    %c8 = arith.constant 8 : index
    %c0_16 = arith.constant 0 : index
    %32 = vector.load %arg3[%c8, %c0_16] : memref<108x9xf32, #tpu.memory_space<vmem>>, vector<4x9xf32>
    %c12 = arith.constant 12 : index
    %c0_17 = arith.constant 0 : index
    %33 = vector.load %arg3[%c12, %c0_17] : memref<108x9xf32, #tpu.memory_space<vmem>>, vector<4x9xf32>
    %34 = vector.extract_strided_slice %32 {offsets = [0, 4], sizes = [4, 1], strides = [1, 1]} : vector<4x9xf32> to vector<4x1xf32>
    %35 = vector.broadcast %34 : vector<4x1xf32> to vector<4x256xf32>
    %36 = arith.mulf %26, %35 : vector<4x256xf32>
    %c8_18 = arith.constant 8 : index
    %c0_19 = arith.constant 0 : index
    %37 = vector.load %arg2[%c8_18, %c0_19] : memref<44x1xf32, #tpu.memory_space<vmem>>, vector<4x1xf32>
    %38 = vector.broadcast %37 : vector<4x1xf32> to vector<4x256xf32>
    %39 = arith.addf %36, %38 : vector<4x256xf32>
    %40 = vector.extract_strided_slice %33 {offsets = [0, 4], sizes = [4, 1], strides = [1, 1]} : vector<4x9xf32> to vector<4x1xf32>
    %41 = vector.broadcast %40 : vector<4x1xf32> to vector<4x256xf32>
    %42 = arith.mulf %31, %41 : vector<4x256xf32>
    %c12_20 = arith.constant 12 : index
    %c0_21 = arith.constant 0 : index
    %43 = vector.load %arg2[%c12_20, %c0_21] : memref<44x1xf32, #tpu.memory_space<vmem>>, vector<4x1xf32>
    %44 = vector.broadcast %43 : vector<4x1xf32> to vector<4x256xf32>
    %45 = arith.addf %42, %44 : vector<4x256xf32>
    %c17_i32 = arith.constant 17 : i32
    %46 = tpu.dynamic_rotate %26 by %c17_i32 dim 1 : vector<4x256xf32>, i32 -> vector<4x256xf32>
    %c0_22 = arith.constant 0 : index
    %c0_23 = arith.constant 0 : index
    %47 = vector.load %arg4[%c0_22, %c0_23] : memref<9x256xf32, #tpu.memory_space<vmem>>, vector<1x256xf32>
    %48 = vector.broadcast %47 : vector<1x256xf32> to vector<4x256xf32>
    %49 = arith.mulf %46, %48 : vector<4x256xf32>
    %50 = vector.extract_strided_slice %32 {offsets = [0, 0], sizes = [4, 1], strides = [1, 1]} : vector<4x9xf32> to vector<4x1xf32>
    %51 = vector.broadcast %50 : vector<4x1xf32> to vector<4x256xf32>
    %52 = arith.mulf %49, %51 : vector<4x256xf32>
    %53 = arith.addf %39, %52 : vector<4x256xf32>
    %c17_i32_24 = arith.constant 17 : i32
    %54 = tpu.dynamic_rotate %31 by %c17_i32_24 dim 1 : vector<4x256xf32>, i32 -> vector<4x256xf32>
    %c0_25 = arith.constant 0 : index
    %c0_26 = arith.constant 0 : index
    %55 = vector.load %arg4[%c0_25, %c0_26] : memref<9x256xf32, #tpu.memory_space<vmem>>, vector<1x256xf32>
    %56 = vector.broadcast %55 : vector<1x256xf32> to vector<4x256xf32>
    %57 = arith.mulf %54, %56 : vector<4x256xf32>
    %58 = vector.extract_strided_slice %33 {offsets = [0, 0], sizes = [4, 1], strides = [1, 1]} : vector<4x9xf32> to vector<4x1xf32>
    %59 = vector.broadcast %58 : vector<4x1xf32> to vector<4x256xf32>
    %60 = arith.mulf %57, %59 : vector<4x256xf32>
    %61 = arith.addf %45, %60 : vector<4x256xf32>
    %c16_i32 = arith.constant 16 : i32
    %62 = tpu.dynamic_rotate %26 by %c16_i32 dim 1 : vector<4x256xf32>, i32 -> vector<4x256xf32>
    %c1 = arith.constant 1 : index
    %c0_27 = arith.constant 0 : index
    %63 = vector.load %arg4[%c1, %c0_27] : memref<9x256xf32, #tpu.memory_space<vmem>>, vector<1x256xf32>
    %64 = vector.broadcast %63 : vector<1x256xf32> to vector<4x256xf32>
    %65 = arith.mulf %62, %64 : vector<4x256xf32>
    %66 = vector.extract_strided_slice %32 {offsets = [0, 1], sizes = [4, 1], strides = [1, 1]} : vector<4x9xf32> to vector<4x1xf32>
    %67 = vector.broadcast %66 : vector<4x1xf32> to vector<4x256xf32>
    %68 = arith.mulf %65, %67 : vector<4x256xf32>
    %69 = arith.addf %53, %68 : vector<4x256xf32>
    %c16_i32_28 = arith.constant 16 : i32
    %70 = tpu.dynamic_rotate %31 by %c16_i32_28 dim 1 : vector<4x256xf32>, i32 -> vector<4x256xf32>
    %c1_29 = arith.constant 1 : index
    %c0_30 = arith.constant 0 : index
    %71 = vector.load %arg4[%c1_29, %c0_30] : memref<9x256xf32, #tpu.memory_space<vmem>>, vector<1x256xf32>
    %72 = vector.broadcast %71 : vector<1x256xf32> to vector<4x256xf32>
    %73 = arith.mulf %70, %72 : vector<4x256xf32>
    %74 = vector.extract_strided_slice %33 {offsets = [0, 1], sizes = [4, 1], strides = [1, 1]} : vector<4x9xf32> to vector<4x1xf32>
    %75 = vector.broadcast %74 : vector<4x1xf32> to vector<4x256xf32>
    %76 = arith.mulf %73, %75 : vector<4x256xf32>
    %77 = arith.addf %61, %76 : vector<4x256xf32>
    %c15_i32 = arith.constant 15 : i32
    %78 = tpu.dynamic_rotate %26 by %c15_i32 dim 1 : vector<4x256xf32>, i32 -> vector<4x256xf32>
    %c2 = arith.constant 2 : index
    %c0_31 = arith.constant 0 : index
    %79 = vector.load %arg4[%c2, %c0_31] : memref<9x256xf32, #tpu.memory_space<vmem>>, vector<1x256xf32>
    %80 = vector.broadcast %79 : vector<1x256xf32> to vector<4x256xf32>
    %81 = arith.mulf %78, %80 : vector<4x256xf32>
    %82 = vector.extract_strided_slice %32 {offsets = [0, 2], sizes = [4, 1], strides = [1, 1]} : vector<4x9xf32> to vector<4x1xf32>
    %83 = vector.broadcast %82 : vector<4x1xf32> to vector<4x256xf32>
    %84 = arith.mulf %81, %83 : vector<4x256xf32>
    %85 = arith.addf %69, %84 : vector<4x256xf32>
    %c15_i32_32 = arith.constant 15 : i32
    %86 = tpu.dynamic_rotate %31 by %c15_i32_32 dim 1 : vector<4x256xf32>, i32 -> vector<4x256xf32>
    %c2_33 = arith.constant 2 : index
    %c0_34 = arith.constant 0 : index
    %87 = vector.load %arg4[%c2_33, %c0_34] : memref<9x256xf32, #tpu.memory_space<vmem>>, vector<1x256xf32>
    %88 = vector.broadcast %87 : vector<1x256xf32> to vector<4x256xf32>
    %89 = arith.mulf %86, %88 : vector<4x256xf32>
    %90 = vector.extract_strided_slice %33 {offsets = [0, 2], sizes = [4, 1], strides = [1, 1]} : vector<4x9xf32> to vector<4x1xf32>
    %91 = vector.broadcast %90 : vector<4x1xf32> to vector<4x256xf32>
    %92 = arith.mulf %89, %91 : vector<4x256xf32>
    %93 = arith.addf %77, %92 : vector<4x256xf32>
    %c1_i32 = arith.constant 1 : i32
    %94 = tpu.dynamic_rotate %26 by %c1_i32 dim 1 : vector<4x256xf32>, i32 -> vector<4x256xf32>
    %c3 = arith.constant 3 : index
    %c0_35 = arith.constant 0 : index
    %95 = vector.load %arg4[%c3, %c0_35] : memref<9x256xf32, #tpu.memory_space<vmem>>, vector<1x256xf32>
    %96 = vector.broadcast %95 : vector<1x256xf32> to vector<4x256xf32>
    %97 = arith.mulf %94, %96 : vector<4x256xf32>
    %98 = vector.extract_strided_slice %32 {offsets = [0, 3], sizes = [4, 1], strides = [1, 1]} : vector<4x9xf32> to vector<4x1xf32>
    %99 = vector.broadcast %98 : vector<4x1xf32> to vector<4x256xf32>
    %100 = arith.mulf %97, %99 : vector<4x256xf32>
    %101 = arith.addf %85, %100 : vector<4x256xf32>
    %c1_i32_36 = arith.constant 1 : i32
    %102 = tpu.dynamic_rotate %31 by %c1_i32_36 dim 1 : vector<4x256xf32>, i32 -> vector<4x256xf32>
    %c3_37 = arith.constant 3 : index
    %c0_38 = arith.constant 0 : index
    %103 = vector.load %arg4[%c3_37, %c0_38] : memref<9x256xf32, #tpu.memory_space<vmem>>, vector<1x256xf32>
    %104 = vector.broadcast %103 : vector<1x256xf32> to vector<4x256xf32>
    %105 = arith.mulf %102, %104 : vector<4x256xf32>
    %106 = vector.extract_strided_slice %33 {offsets = [0, 3], sizes = [4, 1], strides = [1, 1]} : vector<4x9xf32> to vector<4x1xf32>
    %107 = vector.broadcast %106 : vector<4x1xf32> to vector<4x256xf32>
    %108 = arith.mulf %105, %107 : vector<4x256xf32>
    %109 = arith.addf %93, %108 : vector<4x256xf32>
    %c255_i32 = arith.constant 255 : i32
    %110 = tpu.dynamic_rotate %26 by %c255_i32 dim 1 : vector<4x256xf32>, i32 -> vector<4x256xf32>
    %c5 = arith.constant 5 : index
    %c0_39 = arith.constant 0 : index
    %111 = vector.load %arg4[%c5, %c0_39] : memref<9x256xf32, #tpu.memory_space<vmem>>, vector<1x256xf32>
    %112 = vector.broadcast %111 : vector<1x256xf32> to vector<4x256xf32>
    %113 = arith.mulf %110, %112 : vector<4x256xf32>
    %114 = vector.extract_strided_slice %32 {offsets = [0, 5], sizes = [4, 1], strides = [1, 1]} : vector<4x9xf32> to vector<4x1xf32>
    %115 = vector.broadcast %114 : vector<4x1xf32> to vector<4x256xf32>
    %116 = arith.mulf %113, %115 : vector<4x256xf32>
    %117 = arith.addf %101, %116 : vector<4x256xf32>
    %c255_i32_40 = arith.constant 255 : i32
    %118 = tpu.dynamic_rotate %31 by %c255_i32_40 dim 1 : vector<4x256xf32>, i32 -> vector<4x256xf32>
    %c5_41 = arith.constant 5 : index
    %c0_42 = arith.constant 0 : index
    %119 = vector.load %arg4[%c5_41, %c0_42] : memref<9x256xf32, #tpu.memory_space<vmem>>, vector<1x256xf32>
    %120 = vector.broadcast %119 : vector<1x256xf32> to vector<4x256xf32>
    %121 = arith.mulf %118, %120 : vector<4x256xf32>
    %122 = vector.extract_strided_slice %33 {offsets = [0, 5], sizes = [4, 1], strides = [1, 1]} : vector<4x9xf32> to vector<4x1xf32>
    %123 = vector.broadcast %122 : vector<4x1xf32> to vector<4x256xf32>
    %124 = arith.mulf %121, %123 : vector<4x256xf32>
    %125 = arith.addf %109, %124 : vector<4x256xf32>
    %c241_i32 = arith.constant 241 : i32
    %126 = tpu.dynamic_rotate %26 by %c241_i32 dim 1 : vector<4x256xf32>, i32 -> vector<4x256xf32>
    %c6 = arith.constant 6 : index
    %c0_43 = arith.constant 0 : index
    %127 = vector.load %arg4[%c6, %c0_43] : memref<9x256xf32, #tpu.memory_space<vmem>>, vector<1x256xf32>
    %128 = vector.broadcast %127 : vector<1x256xf32> to vector<4x256xf32>
    %129 = arith.mulf %126, %128 : vector<4x256xf32>
    %130 = vector.extract_strided_slice %32 {offsets = [0, 6], sizes = [4, 1], strides = [1, 1]} : vector<4x9xf32> to vector<4x1xf32>
    %131 = vector.broadcast %130 : vector<4x1xf32> to vector<4x256xf32>
    %132 = arith.mulf %129, %131 : vector<4x256xf32>
    %133 = arith.addf %117, %132 : vector<4x256xf32>
    %c241_i32_44 = arith.constant 241 : i32
    %134 = tpu.dynamic_rotate %31 by %c241_i32_44 dim 1 : vector<4x256xf32>, i32 -> vector<4x256xf32>
    %c6_45 = arith.constant 6 : index
    %c0_46 = arith.constant 0 : index
    %135 = vector.load %arg4[%c6_45, %c0_46] : memref<9x256xf32, #tpu.memory_space<vmem>>, vector<1x256xf32>
    %136 = vector.broadcast %135 : vector<1x256xf32> to vector<4x256xf32>
    %137 = arith.mulf %134, %136 : vector<4x256xf32>
    %138 = vector.extract_strided_slice %33 {offsets = [0, 6], sizes = [4, 1], strides = [1, 1]} : vector<4x9xf32> to vector<4x1xf32>
    %139 = vector.broadcast %138 : vector<4x1xf32> to vector<4x256xf32>
    %140 = arith.mulf %137, %139 : vector<4x256xf32>
    %141 = arith.addf %125, %140 : vector<4x256xf32>
    %c240_i32 = arith.constant 240 : i32
    %142 = tpu.dynamic_rotate %26 by %c240_i32 dim 1 : vector<4x256xf32>, i32 -> vector<4x256xf32>
    %c7 = arith.constant 7 : index
    %c0_47 = arith.constant 0 : index
    %143 = vector.load %arg4[%c7, %c0_47] : memref<9x256xf32, #tpu.memory_space<vmem>>, vector<1x256xf32>
    %144 = vector.broadcast %143 : vector<1x256xf32> to vector<4x256xf32>
    %145 = arith.mulf %142, %144 : vector<4x256xf32>
    %146 = vector.extract_strided_slice %32 {offsets = [0, 7], sizes = [4, 1], strides = [1, 1]} : vector<4x9xf32> to vector<4x1xf32>
    %147 = vector.broadcast %146 : vector<4x1xf32> to vector<4x256xf32>
    %148 = arith.mulf %145, %147 : vector<4x256xf32>
    %149 = arith.addf %133, %148 : vector<4x256xf32>
    %c240_i32_48 = arith.constant 240 : i32
    %150 = tpu.dynamic_rotate %31 by %c240_i32_48 dim 1 : vector<4x256xf32>, i32 -> vector<4x256xf32>
    %c7_49 = arith.constant 7 : index
    %c0_50 = arith.constant 0 : index
    %151 = vector.load %arg4[%c7_49, %c0_50] : memref<9x256xf32, #tpu.memory_space<vmem>>, vector<1x256xf32>
    %152 = vector.broadcast %151 : vector<1x256xf32> to vector<4x256xf32>
    %153 = arith.mulf %150, %152 : vector<4x256xf32>
    %154 = vector.extract_strided_slice %33 {offsets = [0, 7], sizes = [4, 1], strides = [1, 1]} : vector<4x9xf32> to vector<4x1xf32>
    %155 = vector.broadcast %154 : vector<4x1xf32> to vector<4x256xf32>
    %156 = arith.mulf %153, %155 : vector<4x256xf32>
    %157 = arith.addf %141, %156 : vector<4x256xf32>
    %c239_i32 = arith.constant 239 : i32
    %158 = tpu.dynamic_rotate %26 by %c239_i32 dim 1 : vector<4x256xf32>, i32 -> vector<4x256xf32>
    %c8_51 = arith.constant 8 : index
    %c0_52 = arith.constant 0 : index
    %159 = vector.load %arg4[%c8_51, %c0_52] : memref<9x256xf32, #tpu.memory_space<vmem>>, vector<1x256xf32>
    %160 = vector.broadcast %159 : vector<1x256xf32> to vector<4x256xf32>
    %161 = arith.mulf %158, %160 : vector<4x256xf32>
    %162 = vector.extract_strided_slice %32 {offsets = [0, 8], sizes = [4, 1], strides = [1, 1]} : vector<4x9xf32> to vector<4x1xf32>
    %163 = vector.broadcast %162 : vector<4x1xf32> to vector<4x256xf32>
    %164 = arith.mulf %161, %163 : vector<4x256xf32>
    %165 = arith.addf %149, %164 : vector<4x256xf32>
    %c239_i32_53 = arith.constant 239 : i32
    %166 = tpu.dynamic_rotate %31 by %c239_i32_53 dim 1 : vector<4x256xf32>, i32 -> vector<4x256xf32>
    %c8_54 = arith.constant 8 : index
    %c0_55 = arith.constant 0 : index
    %167 = vector.load %arg4[%c8_54, %c0_55] : memref<9x256xf32, #tpu.memory_space<vmem>>, vector<1x256xf32>
    %168 = vector.broadcast %167 : vector<1x256xf32> to vector<4x256xf32>
    %169 = arith.mulf %166, %168 : vector<4x256xf32>
    %170 = vector.extract_strided_slice %33 {offsets = [0, 8], sizes = [4, 1], strides = [1, 1]} : vector<4x9xf32> to vector<4x1xf32>
    %171 = vector.broadcast %170 : vector<4x1xf32> to vector<4x256xf32>
    %172 = arith.mulf %169, %171 : vector<4x256xf32>
    %173 = arith.addf %157, %172 : vector<4x256xf32>
    %174 = arith.mulf %165, %173 : vector<4x256xf32>
    %cst_56 = arith.constant dense<0.000000e+00> : vector<4xf32>
    %175 = vector.multi_reduction <add>, %174, %cst_56 [1] : vector<4x256xf32> to vector<4xf32>
    %176 = vector.shape_cast %175 : vector<4xf32> to vector<4x1xf32>
    %cst_57 = arith.constant 2.560000e+02 : f32
    %177 = vector.broadcast %cst_57 : f32 to vector<4x1xf32>
    %178 = arith.divf %176, %177 : vector<4x1xf32>
    %c16 = arith.constant 16 : index
    %c0_58 = arith.constant 0 : index
    %179 = vector.load %arg3[%c16, %c0_58] : memref<108x9xf32, #tpu.memory_space<vmem>>, vector<4x4xf32>
    %cst_59 = arith.constant dense<0.000000e+00> : vector<4x1xf32>
    %180 = tpu.matmul %179, %178, %cst_59 {dimension_numbers = #tpu.dot_dimension_numbers<[1], [0], [0], [1], [0, 0, 1, 1], [], []>} : vector<4x4xf32>, vector<4x1xf32>, vector<4x1xf32> -> vector<4x1xf32>
    %c16_60 = arith.constant 16 : index
    %c0_61 = arith.constant 0 : index
    %181 = vector.load %arg2[%c16_60, %c0_61] : memref<44x1xf32, #tpu.memory_space<vmem>>, vector<4x1xf32>
    %182 = arith.addf %180, %181 : vector<4x1xf32>
    %183 = vector.broadcast %182 : vector<4x1xf32> to vector<4x256xf32>
    %184 = arith.mulf %174, %183 : vector<4x256xf32>
    %c20 = arith.constant 20 : index
    %c0_62 = arith.constant 0 : index
    %185 = vector.load %arg3[%c20, %c0_62] : memref<108x9xf32, #tpu.memory_space<vmem>>, vector<4x4xf32>
    %cst_63 = arith.constant dense<0.000000e+00> : vector<4x256xf32>
    %186 = tpu.matmul %185, %184, %cst_63 {dimension_numbers = #tpu.dot_dimension_numbers<[1], [0], [0], [1], [0, 0, 1, 1], [], []>} : vector<4x4xf32>, vector<4x256xf32>, vector<4x256xf32> -> vector<4x256xf32>
    %187 = arith.addf %1, %186 : vector<4x256xf32>
    %c20_64 = arith.constant 20 : index
    %c0_65 = arith.constant 0 : index
    %188 = vector.load %arg2[%c20_64, %c0_65] : memref<44x1xf32, #tpu.memory_space<vmem>>, vector<4x1xf32>
    %189 = vector.broadcast %188 : vector<4x1xf32> to vector<4x256xf32>
    %190 = arith.addf %187, %189 : vector<4x256xf32>
    %cst_66 = arith.constant dense<0.000000e+00> : vector<256xf32>
    %191 = vector.multi_reduction <add>, %190, %cst_66 [0] : vector<4x256xf32> to vector<256xf32>
    %192 = vector.shape_cast %191 : vector<256xf32> to vector<1x256xf32>
    %cst_67 = arith.constant 4.000000e+00 : f32
    %193 = vector.broadcast %cst_67 : f32 to vector<1x256xf32>
    %194 = arith.divf %192, %193 : vector<1x256xf32>
    %195 = arith.mulf %190, %190 : vector<4x256xf32>
    %cst_68 = arith.constant dense<0.000000e+00> : vector<256xf32>
    %196 = vector.multi_reduction <add>, %195, %cst_68 [0] : vector<4x256xf32> to vector<256xf32>
    %197 = vector.shape_cast %196 : vector<256xf32> to vector<1x256xf32>
    %cst_69 = arith.constant 4.000000e+00 : f32
    %198 = vector.broadcast %cst_69 : f32 to vector<1x256xf32>
    %199 = arith.divf %197, %198 : vector<1x256xf32>
    %200 = arith.mulf %194, %194 : vector<1x256xf32>
    %201 = arith.subf %199, %200 : vector<1x256xf32>
    %cst_70 = arith.constant 0.000000e+00 : f32
    %202 = vector.broadcast %cst_70 : f32 to vector<1x256xf32>
    %203 = arith.maximumf %201, %202 : vector<1x256xf32>
    %204 = vector.broadcast %194 : vector<1x256xf32> to vector<4x256xf32>
    %205 = arith.subf %190, %204 : vector<4x256xf32>
    %cst_71 = arith.constant 9.99999997E-7 : f32
    %206 = vector.broadcast %cst_71 : f32 to vector<1x256xf32>
    %207 = arith.addf %203, %206 : vector<1x256xf32>
    %208 = math.rsqrt %207 : vector<1x256xf32>
    %209 = vector.broadcast %208 : vector<1x256xf32> to vector<4x256xf32>
    %210 = arith.mulf %205, %209 : vector<4x256xf32>
    %c24 = arith.constant 24 : index
    %c0_72 = arith.constant 0 : index
    %211 = vector.load %arg3[%c24, %c0_72] : memref<108x9xf32, #tpu.memory_space<vmem>>, vector<4x4xf32>
    %cst_73 = arith.constant dense<0.000000e+00> : vector<4x256xf32>
    %212 = tpu.matmul %211, %210, %cst_73 {dimension_numbers = #tpu.dot_dimension_numbers<[1], [0], [0], [1], [0, 0, 1, 1], [], []>} : vector<4x4xf32>, vector<4x256xf32>, vector<4x256xf32> -> vector<4x256xf32>
    %c24_74 = arith.constant 24 : index
    %c0_75 = arith.constant 0 : index
    %213 = vector.load %arg2[%c24_74, %c0_75] : memref<44x1xf32, #tpu.memory_space<vmem>>, vector<4x1xf32>
    %214 = vector.broadcast %213 : vector<4x1xf32> to vector<4x256xf32>
    %215 = arith.addf %212, %214 : vector<4x256xf32>
    %c28 = arith.constant 28 : index
    %c0_76 = arith.constant 0 : index
    %216 = vector.load %arg3[%c28, %c0_76] : memref<108x9xf32, #tpu.memory_space<vmem>>, vector<4x4xf32>
    %cst_77 = arith.constant dense<0.000000e+00> : vector<4x256xf32>
    %217 = tpu.matmul %216, %210, %cst_77 {dimension_numbers = #tpu.dot_dimension_numbers<[1], [0], [0], [1], [0, 0, 1, 1], [], []>} : vector<4x4xf32>, vector<4x256xf32>, vector<4x256xf32> -> vector<4x256xf32>
    %c28_78 = arith.constant 28 : index
    %c0_79 = arith.constant 0 : index
    %218 = vector.load %arg2[%c28_78, %c0_79] : memref<44x1xf32, #tpu.memory_space<vmem>>, vector<4x1xf32>
    %219 = vector.broadcast %218 : vector<4x1xf32> to vector<4x256xf32>
    %220 = arith.addf %217, %219 : vector<4x256xf32>
    %221 = arith.mulf %215, %220 : vector<4x256xf32>
    %c32 = arith.constant 32 : index
    %c0_80 = arith.constant 0 : index
    %222 = vector.load %arg3[%c32, %c0_80] : memref<108x9xf32, #tpu.memory_space<vmem>>, vector<4x4xf32>
    %cst_81 = arith.constant dense<0.000000e+00> : vector<4x256xf32>
    %223 = tpu.matmul %222, %221, %cst_81 {dimension_numbers = #tpu.dot_dimension_numbers<[1], [0], [0], [1], [0, 0, 1, 1], [], []>} : vector<4x4xf32>, vector<4x256xf32>, vector<4x256xf32> -> vector<4x256xf32>
    %224 = arith.addf %190, %223 : vector<4x256xf32>
    %c32_82 = arith.constant 32 : index
    %c0_83 = arith.constant 0 : index
    %225 = vector.load %arg2[%c32_82, %c0_83] : memref<44x1xf32, #tpu.memory_space<vmem>>, vector<4x1xf32>
    %226 = vector.broadcast %225 : vector<4x1xf32> to vector<4x256xf32>
    %227 = arith.addf %224, %226 : vector<4x256xf32>
    %c36 = arith.constant 36 : index
    %c0_84 = arith.constant 0 : index
    %228 = vector.load %arg3[%c36, %c0_84] : memref<108x9xf32, #tpu.memory_space<vmem>>, vector<72x4xf32>
    %229 = vector.extract_strided_slice %228 {offsets = [32, 0], sizes = [8, 4], strides = [1, 1]} : vector<72x4xf32> to vector<8x4xf32>
    %cst_85 = arith.constant dense<0.000000e+00> : vector<8x256xf32>
    %230 = tpu.matmul %229, %227, %cst_85 {dimension_numbers = #tpu.dot_dimension_numbers<[1], [0], [0], [1], [0, 0, 1, 1], [], []>} : vector<8x4xf32>, vector<4x256xf32>, vector<8x256xf32> -> vector<8x256xf32>
    %231 = vector.extract_strided_slice %228 {offsets = [0, 0], sizes = [8, 4], strides = [1, 1]} : vector<72x4xf32> to vector<8x4xf32>
    %c17_i32_86 = arith.constant 17 : i32
    %232 = tpu.dynamic_rotate %227 by %c17_i32_86 dim 1 : vector<4x256xf32>, i32 -> vector<4x256xf32>
    %c0_87 = arith.constant 0 : index
    %c0_88 = arith.constant 0 : index
    %233 = vector.load %arg4[%c0_87, %c0_88] : memref<9x256xf32, #tpu.memory_space<vmem>>, vector<1x256xf32>
    %234 = vector.broadcast %233 : vector<1x256xf32> to vector<4x256xf32>
    %235 = arith.mulf %232, %234 : vector<4x256xf32>
    %cst_89 = arith.constant dense<0.000000e+00> : vector<8x256xf32>
    %236 = tpu.matmul %231, %235, %cst_89 {dimension_numbers = #tpu.dot_dimension_numbers<[1], [0], [0], [1], [0, 0, 1, 1], [], []>} : vector<8x4xf32>, vector<4x256xf32>, vector<8x256xf32> -> vector<8x256xf32>
    %237 = arith.addf %230, %236 : vector<8x256xf32>
    %238 = vector.extract_strided_slice %228 {offsets = [8, 0], sizes = [8, 4], strides = [1, 1]} : vector<72x4xf32> to vector<8x4xf32>
    %c16_i32_90 = arith.constant 16 : i32
    %239 = tpu.dynamic_rotate %227 by %c16_i32_90 dim 1 : vector<4x256xf32>, i32 -> vector<4x256xf32>
    %c1_91 = arith.constant 1 : index
    %c0_92 = arith.constant 0 : index
    %240 = vector.load %arg4[%c1_91, %c0_92] : memref<9x256xf32, #tpu.memory_space<vmem>>, vector<1x256xf32>
    %241 = vector.broadcast %240 : vector<1x256xf32> to vector<4x256xf32>
    %242 = arith.mulf %239, %241 : vector<4x256xf32>
    %cst_93 = arith.constant dense<0.000000e+00> : vector<8x256xf32>
    %243 = tpu.matmul %238, %242, %cst_93 {dimension_numbers = #tpu.dot_dimension_numbers<[1], [0], [0], [1], [0, 0, 1, 1], [], []>} : vector<8x4xf32>, vector<4x256xf32>, vector<8x256xf32> -> vector<8x256xf32>
    %244 = arith.addf %237, %243 : vector<8x256xf32>
    %245 = vector.extract_strided_slice %228 {offsets = [16, 0], sizes = [8, 4], strides = [1, 1]} : vector<72x4xf32> to vector<8x4xf32>
    %c15_i32_94 = arith.constant 15 : i32
    %246 = tpu.dynamic_rotate %227 by %c15_i32_94 dim 1 : vector<4x256xf32>, i32 -> vector<4x256xf32>
    %c2_95 = arith.constant 2 : index
    %c0_96 = arith.constant 0 : index
    %247 = vector.load %arg4[%c2_95, %c0_96] : memref<9x256xf32, #tpu.memory_space<vmem>>, vector<1x256xf32>
    %248 = vector.broadcast %247 : vector<1x256xf32> to vector<4x256xf32>
    %249 = arith.mulf %246, %248 : vector<4x256xf32>
    %cst_97 = arith.constant dense<0.000000e+00> : vector<8x256xf32>
    %250 = tpu.matmul %245, %249, %cst_97 {dimension_numbers = #tpu.dot_dimension_numbers<[1], [0], [0], [1], [0, 0, 1, 1], [], []>} : vector<8x4xf32>, vector<4x256xf32>, vector<8x256xf32> -> vector<8x256xf32>
    %251 = arith.addf %244, %250 : vector<8x256xf32>
    %252 = vector.extract_strided_slice %228 {offsets = [24, 0], sizes = [8, 4], strides = [1, 1]} : vector<72x4xf32> to vector<8x4xf32>
    %c1_i32_98 = arith.constant 1 : i32
    %253 = tpu.dynamic_rotate %227 by %c1_i32_98 dim 1 : vector<4x256xf32>, i32 -> vector<4x256xf32>
    %c3_99 = arith.constant 3 : index
    %c0_100 = arith.constant 0 : index
    %254 = vector.load %arg4[%c3_99, %c0_100] : memref<9x256xf32, #tpu.memory_space<vmem>>, vector<1x256xf32>
    %255 = vector.broadcast %254 : vector<1x256xf32> to vector<4x256xf32>
    %256 = arith.mulf %253, %255 : vector<4x256xf32>
    %cst_101 = arith.constant dense<0.000000e+00> : vector<8x256xf32>
    %257 = tpu.matmul %252, %256, %cst_101 {dimension_numbers = #tpu.dot_dimension_numbers<[1], [0], [0], [1], [0, 0, 1, 1], [], []>} : vector<8x4xf32>, vector<4x256xf32>, vector<8x256xf32> -> vector<8x256xf32>
    %258 = arith.addf %251, %257 : vector<8x256xf32>
    %259 = vector.extract_strided_slice %228 {offsets = [40, 0], sizes = [8, 4], strides = [1, 1]} : vector<72x4xf32> to vector<8x4xf32>
    %c255_i32_102 = arith.constant 255 : i32
    %260 = tpu.dynamic_rotate %227 by %c255_i32_102 dim 1 : vector<4x256xf32>, i32 -> vector<4x256xf32>
    %c5_103 = arith.constant 5 : index
    %c0_104 = arith.constant 0 : index
    %261 = vector.load %arg4[%c5_103, %c0_104] : memref<9x256xf32, #tpu.memory_space<vmem>>, vector<1x256xf32>
    %262 = vector.broadcast %261 : vector<1x256xf32> to vector<4x256xf32>
    %263 = arith.mulf %260, %262 : vector<4x256xf32>
    %cst_105 = arith.constant dense<0.000000e+00> : vector<8x256xf32>
    %264 = tpu.matmul %259, %263, %cst_105 {dimension_numbers = #tpu.dot_dimension_numbers<[1], [0], [0], [1], [0, 0, 1, 1], [], []>} : vector<8x4xf32>, vector<4x256xf32>, vector<8x256xf32> -> vector<8x256xf32>
    %265 = arith.addf %258, %264 : vector<8x256xf32>
    %266 = vector.extract_strided_slice %228 {offsets = [48, 0], sizes = [8, 4], strides = [1, 1]} : vector<72x4xf32> to vector<8x4xf32>
    %c241_i32_106 = arith.constant 241 : i32
    %267 = tpu.dynamic_rotate %227 by %c241_i32_106 dim 1 : vector<4x256xf32>, i32 -> vector<4x256xf32>
    %c6_107 = arith.constant 6 : index
    %c0_108 = arith.constant 0 : index
    %268 = vector.load %arg4[%c6_107, %c0_108] : memref<9x256xf32, #tpu.memory_space<vmem>>, vector<1x256xf32>
    %269 = vector.broadcast %268 : vector<1x256xf32> to vector<4x256xf32>
    %270 = arith.mulf %267, %269 : vector<4x256xf32>
    %cst_109 = arith.constant dense<0.000000e+00> : vector<8x256xf32>
    %271 = tpu.matmul %266, %270, %cst_109 {dimension_numbers = #tpu.dot_dimension_numbers<[1], [0], [0], [1], [0, 0, 1, 1], [], []>} : vector<8x4xf32>, vector<4x256xf32>, vector<8x256xf32> -> vector<8x256xf32>
    %272 = arith.addf %265, %271 : vector<8x256xf32>
    %273 = vector.extract_strided_slice %228 {offsets = [56, 0], sizes = [8, 4], strides = [1, 1]} : vector<72x4xf32> to vector<8x4xf32>
    %c240_i32_110 = arith.constant 240 : i32
    %274 = tpu.dynamic_rotate %227 by %c240_i32_110 dim 1 : vector<4x256xf32>, i32 -> vector<4x256xf32>
    %c7_111 = arith.constant 7 : index
    %c0_112 = arith.constant 0 : index
    %275 = vector.load %arg4[%c7_111, %c0_112] : memref<9x256xf32, #tpu.memory_space<vmem>>, vector<1x256xf32>
    %276 = vector.broadcast %275 : vector<1x256xf32> to vector<4x256xf32>
    %277 = arith.mulf %274, %276 : vector<4x256xf32>
    %cst_113 = arith.constant dense<0.000000e+00> : vector<8x256xf32>
    %278 = tpu.matmul %273, %277, %cst_113 {dimension_numbers = #tpu.dot_dimension_numbers<[1], [0], [0], [1], [0, 0, 1, 1], [], []>} : vector<8x4xf32>, vector<4x256xf32>, vector<8x256xf32> -> vector<8x256xf32>
    %279 = arith.addf %272, %278 : vector<8x256xf32>
    %280 = vector.extract_strided_slice %228 {offsets = [64, 0], sizes = [8, 4], strides = [1, 1]} : vector<72x4xf32> to vector<8x4xf32>
    %c239_i32_114 = arith.constant 239 : i32
    %281 = tpu.dynamic_rotate %227 by %c239_i32_114 dim 1 : vector<4x256xf32>, i32 -> vector<4x256xf32>
    %c8_115 = arith.constant 8 : index
    %c0_116 = arith.constant 0 : index
    %282 = vector.load %arg4[%c8_115, %c0_116] : memref<9x256xf32, #tpu.memory_space<vmem>>, vector<1x256xf32>
    %283 = vector.broadcast %282 : vector<1x256xf32> to vector<4x256xf32>
    %284 = arith.mulf %281, %283 : vector<4x256xf32>
    %cst_117 = arith.constant dense<0.000000e+00> : vector<8x256xf32>
    %285 = tpu.matmul %280, %284, %cst_117 {dimension_numbers = #tpu.dot_dimension_numbers<[1], [0], [0], [1], [0, 0, 1, 1], [], []>} : vector<8x4xf32>, vector<4x256xf32>, vector<8x256xf32> -> vector<8x256xf32>
    %286 = arith.addf %279, %285 : vector<8x256xf32>
    %c36_118 = arith.constant 36 : index
    %c0_119 = arith.constant 0 : index
    %287 = vector.load %arg2[%c36_118, %c0_119] : memref<44x1xf32, #tpu.memory_space<vmem>>, vector<8x1xf32>
    %288 = vector.broadcast %287 : vector<8x1xf32> to vector<8x256xf32>
    %289 = arith.addf %286, %288 : vector<8x256xf32>
    %c0_120 = arith.constant 0 : index
    %c0_121 = arith.constant 0 : index
    %c0_122 = arith.constant 0 : index
    %290 = vector.load %arg5[%c0_120, %c0_121, %c0_122] : memref<1x8x256xf32, #tpu.memory_space<vmem>>, vector<1x8x256xf32>
    %291 = vector.shape_cast %290 : vector<1x8x256xf32> to vector<8x256xf32>
    %292 = vector.shape_cast %289 : vector<8x256xf32> to vector<1x8x256xf32>
    tpu.vector_store %arg5[%c0_120, %c0_121, %c0_122], %292 {strides = array<i32>} : memref<1x8x256xf32, #tpu.memory_space<vmem>>, vector<1x8x256xf32>,
    return
  }
  func.func @transform_0(%arg0: i32) -> (i32, i32, i32) {
    %c0_i32 = arith.constant 0 : i32
    %c0_i32_0 = arith.constant 0 : i32
    %c0_i32_1 = arith.constant 0 : i32
    return %arg0, %c0_i32, %c0_i32_0 : i32, i32, i32
  }
  func.func @transform_1(%arg0: i32) -> (i32, i32) {
    %c0_i32 = arith.constant 0 : i32
    %c0_i32_0 = arith.constant 0 : i32
    %c0_i32_1 = arith.constant 0 : i32
    return %c0_i32, %c0_i32_0 : i32, i32
  }
  func.func @transform_2(%arg0: i32) -> (i32, i32) {
    %c0_i32 = arith.constant 0 : i32
    %c0_i32_0 = arith.constant 0 : i32
    %c0_i32_1 = arith.constant 0 : i32
    return %c0_i32, %c0_i32_0 : i32, i32
  }
  func.func @transform_3(%arg0: i32) -> (i32, i32) {
    %c0_i32 = arith.constant 0 : i32
    %c0_i32_0 = arith.constant 0 : i32
    %c0_i32_1 = arith.constant 0 : i32
    return %c0_i32, %c0_i32_0 : i32, i32
  }
  func.func @transform_4(%arg0: i32) -> (i32, i32, i32) {
    %c0_i32 = arith.constant 0 : i32
    %c0_i32_0 = arith.constant 0 : i32
    %c0_i32_1 = arith.constant 0 : i32
    return %arg0, %c0_i32, %c0_i32_0 : i32, i32, i32
  }
}

</mosaic_0001>

<bundles_post_ra>
// kernel: tpu_custom_call.1
= control target key start
LH: loop header
LB: loop body
LE: loop exit
PB: predicated region body
PF: predicated region fallthrough
CT: control target
= control target key end

     0   :  { %9 = vsyncpa [#allocation3], 0  ;;  %s3274_s0 = inlined_call_operand.vmem [shape: f32[2,4,256], index: 0, kind: input, shape index: {}]   ;;  %s3275_s1 = inlined_call_operand.vmem [shape: f32[44,1], index: 1, kind: input, shape index: {}]   ;;  %s3276_s2 = inlined_call_operand.vmem [shape: f32[108,9], index: 2, kind: input, shape index: {}]   ;;  %s3277_s3 = inlined_call_operand.vmem [shape: f32[9,256], index: 3, kind: input, shape index: {}]   ;;  %s3278_s4 = inlined_call_operand.hbm [shape: f32[2,8,256], index: 4, kind: output, shape index: {}]  }
   0x1   :  { %11 = vsyncpa [#allocation3 + $0x1], 0  ;;  %s2531_s15 = smov 0   ;;  %s2533_s16 = smov 0  }
   0x2   :  { %s2535_s17 = smov 0   ;;  %s2537_s18 = smov 0  }
   0x3 LB: > { %s2552_s19 = sadd.s32 4294967295, %s2483_s18   ;;  %s2243_s20 = sadd.s32 4294967294, %s2483_s18   ;;  %s2483_s18 = sphi %s2537_s18, %s3290_s18   ;;  %s2479_s17 = sphi %s2535_s17, %s3289_s17   ;;  %s2475_s16 = sphi %s2533_s16, %s3288_s16   ;;  %s2471_s15 = sphi %s2531_s15, %s3287_s15  }
   0x4   : > { %s2556_s21 = sadd.s32 1, %s2483_s18   ;;  %s113_s22 = sadd.s32 1, %s2479_s17 }
   0x5   : > { %s110_s23 = ssub.s32 %s2483_s18, %s2556_s21  ;;  %p123_p0 = scmp.ne.s32.totalorder %s2479_s17, %s2475_s16 }
   0x6   : > { %p111_p1 = scmp.eq.s32.totalorder %s110_s23, 0  ;;  %p124_p2 = scmp.eq.s32.totalorder %s2552_s19, 1 }
   0x7   : > { %p129_p3 = scmp.ne.s32.totalorder %s2475_s16, %s2471_s15  ;;  %p130_p4 = scmp.eq.s32.totalorder %s2243_s20, 1 }
   0x8   : > { %s2567_s24 = scalar_select %p111_p1, %s2479_s17, %s113_s22  }
   0x9   : > { %p2569_p5 = por %p124_p2, %p123_p0  ;;  %p2573_p6 = por %p130_p4, %p129_p3 }
   0xa   : > { %p2246_p7 = scmp.ge.s32.totalorder %s2483_s18, 1  ;;  %p165_p8 = scmp.lt.s32.totalorder %s2483_s18, 3 }
   0xc   : > { %p166_p9 = pnand %p2246_p7, %p165_p8 }
   0xe   : > { %169 = sbr.rel (%p166_p9) target bundleno = 2084 (0x824), region = 36 }
  0x15   : > { %p191_p10 = scmp.lt.s32.totalorder %s2552_s19, 1  ;;  %v3279_v0 = vmov 0.0   ;;  %v259_v1 = vld [vmem:[%s3275_s1] sm:$0xf]  ;;  %v2486_v2 = vmov 0   ;;  %vm200_vm0 = vcmask 1043456  }
  0x16   : > { %339 = vmatprep.mubr.f32.mxu0 %v3279_v0  ;;  %1522 = vmatprep.mubr.f32.mxu1 %v3279_v0  ;;  %v347_v3 = vld [vmem:[%s3275_s1 + $0x4] sm:$0xf]  ;;  %v2596_v4 = vld [vmem:[%s3276_s2 + $0x8] sm:$0xf]  ;;  %v2487_v5 = vmov 4   ;;  %v2488_v19 = vmov 1  }
  0x17   : > { %s192_s29 = scalar_select %p191_p10, %s2552_s19, 1  ;;  %2393 = vset.pattern.permute.xlu0 %v2486_v2  ;;  %2394 = vset.pattern.permute.xlu1 %v2487_v5  ;;  %v2612_v14 = vld [vmem:[%s3276_s2 + $0xc] sm:$0xf]  ;;  %v2489_v33 = vmov 2   ;;  %v2490_v42 = vmov 3   ;;  %v2491_v52 = vmov 5  }
  0x18   : > { %262 = vperm.xlu0 %2393, %v259_v1   ;;  %431 = vperm.xlu1 %2394, %v2596_v4   ;;  %v451_v24 = vld [vmem:[%s3275_s1 + $0xc] sm:$0xf]  ;;  %v2492_v56 = vmov 6   ;;  %v2493_v57 = vmov 7   ;;  %v2494_v61 = vmov 8   ;;  %vm267_vm1 = vcmask 31744  }
  0x19   : > { %s2309_s30 = sshll.u32 %s192_s29, 3  ;;  %v436_v1 = vld [vmem:[%s3275_s1 + $0x8] sm:$0xf]  ;;  %s2495_s5 = smov 17   ;;  %vm2503_vm10 = vmmov 0  }
  0x1a   : > { %s195_s9 = scalar_lea.vmem %s3274_s0, %s2309_s30  ;;  %s2496_s6 = smov 16  }
  0x1b   : > { %v2598_v6 = vld [vmem:[%s195_s9] sm:$0xff]  ;;  %s2497_s7 = smov 15   ;;  %s2498_s8 = smov 127  }
  0x1c   : > { %3284 = vst [vmem:[#allocation5_spill] sm:$0xff] %v2598_v6  ;;  %v198_v7 = vcombine.high %v2598_v6, %v2598_v6  ;;  %v201_v8 = vsel %vm200_vm0, %v2598_v6, 0.0  ;;  %v218_v9 = vmul.f32 %v2598_v6, %v2598_v6  ;;  %350 = vperm.xlu0 %2393, %v347_v3   ;;  %446 = vperm.xlu1 %2394, %v2612_v14   ;;  %s2499_s9 = smov 1   ;;  %s2500_s10 = smov 112  }
  0x1d   : > { %v202_v10 = vrot.slane %v201_v8, 4  ;;  %s2501_s11 = smov 111   ;;  %s2502_s12 = smov 113  }
  0x1e   : > { %v208_v11 = vsel %vm200_vm0, %v198_v7, 0.0  ;;  %v220_v12 = vcombine.high %v218_v9, %v218_v9  ;;  %v222_v13 = vsel %vm200_vm0, %v218_v9, 0.0  ;;  %v258_v7 = vld [vmem:[%s3276_s2] sm:$0xf] }
  0x1f   : > { %v203_v15 = vadd.f32 %v202_v10, %v201_v8  ;;  %v209_v16 = vrot.slane %v208_v11, 4  ;;  %v223_v17 = vrot.slane %v222_v13, 4  ;;  %v346_v8 = vld [vmem:[%s3276_s2 + $0x4] sm:$0xf] }
  0x20   : > { %v229_v18 = vsel %vm200_vm0, %v220_v12, 0.0  ;;  %2396 = vset.pattern.permute.xlu0 %v2488_v19  ;;  %2395 = vset.pattern.permute.xlu1 %v2486_v2 }
  0x21   : > { %v204_v20 = vrot.slane %v203_v15, 2  ;;  %v210_v21 = vadd.f32 %v209_v16, %v208_v11  ;;  %v224_v22 = vadd.f32 %v223_v17, %v222_v13  ;;  %v230_v23 = vrot.slane %v229_v18, 4  ;;  %529 = vperm.xlu0 %2396, %v2596_v4   ;;  %454 = vperm.xlu1 %2395, %v451_v24  }
  0x23   : > { %v205_v25 = vadd.f32 %v204_v20, %v203_v15  ;;  %v211_v26 = vrot.slane %v210_v21, 2  ;;  %v225_v27 = vrot.slane %v224_v22, 2  ;;  %v231_v28 = vadd.f32 %v230_v23, %v229_v18 }
  0x25   : > { %v206_v29 = vrot.slane %v205_v25, 1  ;;  %v212_v30 = vadd.f32 %v211_v26, %v210_v21  ;;  %v226_v31 = vadd.f32 %v225_v27, %v224_v22  ;;  %v232_v32 = vrot.slane %v231_v28, 2  ;;  %2399 = vset.pattern.permute.xlu0 %v2489_v33  ;;  %499 = vperm.xlu1 %2395, %v2612_v14  }
  0x26   : > { %591 = vperm.xlu0 %2399, %v2612_v14  }
  0x27   : > { %v207_v34 = vadd.f32 %v206_v29, %v205_v25  ;;  %v213_v35 = vrot.slane %v212_v30, 1  ;;  %v227_v36 = vrot.slane %v226_v31, 1  ;;  %v233_v37 = vadd.f32 %v232_v32, %v231_v28 }
  0x29   : > { %v214_v38 = vadd.f32 %v213_v35, %v212_v30  ;;  %v216_v39 = vmul.f32 0.25, %v207_v34  ;;  %v228_v40 = vadd.f32 %v227_v36, %v226_v31  ;;  %v234_v41 = vrot.slane %v233_v37, 1  ;;  %2397 = vset.pattern.permute.xlu1 %v2488_v19 }
  0x2a   : > { %2400 = vset.pattern.permute.xlu0 %v2490_v42  ;;  %545 = vperm.xlu1 %2397, %v2612_v14  }
  0x2b   : > { %v217_v43 = vmul.f32 0.25, %v214_v38  ;;  %v235_v44 = vadd.f32 %v234_v41, %v233_v37  ;;  %v236_v45 = vmul.f32 0.25, %v228_v40  ;;  %v238_v46 = vmul.f32 %v216_v39, %v216_v39  ;;  %621 = vperm.xlu0 %2400, %v2596_v4  }
  0x2d   : > { %v237_v47 = vmul.f32 0.25, %v235_v44  ;;  %v239_v48 = vmul.f32 %v217_v43, %v217_v43  ;;  %v240_v49 = vsub.f32 %v236_v45, %v238_v46  ;;  %v246_v58 = vcombine.low %v216_v39, %v217_v43 }
  0x2e   : > { %2398 = vset.pattern.permute.xlu1 %v2489_v33  ;;  %v463_v43 = vlaneseq }
  0x2f   : > { %v241_v50 = vsub.f32 %v237_v47, %v239_v48  ;;  %v242_v51 = vmax.f32 %v240_v49, 0.0  ;;  %2403 = vset.pattern.permute.xlu0 %v2491_v52  ;;  %575 = vperm.xlu1 %2398, %v2596_v4   ;;  %v248_v60 = vsub.f32 %v2598_v6, %v246_v58 }
  0x30   : > { %683 = vperm.xlu0 %2403, %v2612_v14   ;;  %v2764_v45 = vshrl.u32 %v463_v43, 7  ;;  %v2768_v48 = vand.u32 127, %v463_v43 }
  0x31   : > { %v243_v53 = vmax.f32 %v241_v50, 0.0  ;;  %v249_v54 = vadd.f32 1e-06, %v242_v51  ;;  %v468_v51 = vld [vmem:[%s3277_s3] ss:$8 sm:$0x3] }
  0x32   : > { %v2771_v49 = vsub.s32 0, %v2764_v45  ;;  %v2774_v50 = vsub.s32 1, %v2764_v45  ;;  %vm465_vm2 = vcmp.lt.s32.totalorder %v2768_v48, 17  ;;  %vm556_vm3 = vcmp.lt.s32.totalorder %v2768_v48, 15 }
  0x33   : > { %v250_v55 = vadd.f32 1e-06, %v243_v53  ;;  %2413 = vrsqrt.f32 %v249_v54  ;;  %2401 = vset.pattern.permute.xlu1 %v2490_v42  ;;  %vm648_vm4 = vcmp.lt.s32.totalorder %v2768_v48, 127  ;;  %vm510_vm5 = vcmp.lt.s32.totalorder %v2768_v48, 16 }
  0x34   : > { %2404 = vset.pattern.permute.xlu0 %v2492_v56  ;;  %637 = vperm.xlu1 %2401, %v2612_v14   ;;  %v2785_v54 = vrot.slane %v468_v51, %v2771_v49  ;;  %vm602_vm6 = vcmp.lt.s32.totalorder %v2768_v48, 1  ;;  %vm694_vm7 = vcmp.lt.s32.totalorder %v2768_v48, 113  ;;  %vm740_vm8 = vcmp.lt.s32.totalorder %v2768_v48, 112 }
  0x35   : > { %2415 = vrsqrt.f32 %v250_v55  ;;  %713 = vperm.xlu0 %2404, %v2596_v4   ;;  %v2788_v55 = vrot.slane %v468_v51, %v2774_v50  ;;  %vm786_vm9 = vcmp.lt.s32.totalorder %v2768_v48, 111 }
  0x38   : > { %2402 = vset.pattern.permute.xlu1 %v2491_v52 }
  0x39   : > { %2407 = vset.pattern.permute.xlu0 %v2493_v57  ;;  %667 = vperm.xlu1 %2402, %v2596_v4  }
  0x3a   : > { %775 = vperm.xlu0 %2407, %v2612_v14  }
  0x3d   : > { %v2414_v59 = vpop.eup %2413  ;;  %2405 = vset.pattern.permute.xlu1 %v2492_v56 }
  0x3e   : > { %2408 = vset.pattern.permute.xlu0 %v2494_v61  ;;  %729 = vperm.xlu1 %2405, %v2612_v14  }
  0x3f   : > { %v2416_v62 = vpop.eup %2415  ;;  %805 = vperm.xlu0 %2408, %v2596_v4  }
  0x40   : > { %v255_v63 = vcombine.low %v2414_v59, %v2416_v62  ;;  %v2257_v59 = vld [vmem:[%s3277_s3 + $0x2] ss:$8 sm:$0x3] }
  0x42   : > { %v257_v3 = vmul.f32 %v255_v63, %v248_v60  ;;  %2406 = vset.pattern.permute.xlu1 %v2493_v57  ;;  %v2259_v60 = vld [vmem:[%s3277_s3 + $0x5] ss:$8 sm:$0x3] }
  0x43   : > { %2409 = vset.pattern.permute.xlu0 %v2486_v2  ;;  %759 = vperm.xlu1 %2406, %v2596_v4  }
  0x44   : > { %v266_v5 = vcombine.high %v257_v3, %v257_v3  ;;  %439 = vperm.xlu0 %2409, %v436_v1  }
  0x46   : > { %2250 = vmatprep.subr.msk.mxu0 %vm200_vm0, %v266_v5 }
  0x47   : > { %2251 = vmatpush1.msk.msra.mxu0 %vm200_vm0, %v257_v3  ;;  %2410 = vset.pattern.permute.xlu1 %v2494_v61 }
  0x48   : > { %2252 = vmatmul.mubr.msk.f32.vlgmr.msra.gmra.mrb[0].mxu0 %vm267_vm1, %v258_v7  ;;  %2253 = vmatprep.subr.msk.mxu0 %vm200_vm0, %v266_v5  ;;  %v2811_v5 = vrot.slane %v2257_v59, %v2771_v49  ;;  %v2814_v7 = vrot.slane %v2257_v59, %v2774_v50 }
  0x49   : > { %2254 = vmatpush1.msk.msra.mxu0 %vm200_vm0, %v257_v3  ;;  %420 = vmatprep.mubr.f32.mxu0 %v3279_v0  ;;  %v2256_v3 = vld [vmem:[%s3277_s3 + $0x1] ss:$8 sm:$0x3] }
  0x4a   : > { %483 = vperm.xlu0 %2409, %v2596_v4   ;;  %821 = vperm.xlu1 %2410, %v2612_v14  }
  0x4b   : > { %2313 = vmatprep.subr.mxu0 %v3279_v0 }
  0x4c   : > { %2255 = vmatmul.mubr.msk.f32.vlgmr.msra.gmra.mrb[2].mxu0 %vm267_vm1, %v346_v8 }
  0x4e   : > { %2411 = vset.pattern.permute.xlu1 %v2486_v2 }
  0x97   : > { %v263_v9 = vpop.permute.xlu0 %262  ;;  %v432_v17 = vpop.permute.xlu1 %431 }
  0x9b   : > { %v351_v2 = vpop.permute.xlu0 %350  ;;  %v2720_v18 = vpop.permute.xlu1 %446 }
  0xa0   : > { %v2724_v19 = vpop.permute.xlu0 %529  ;;  %v2726_v20 = vpop.permute.xlu1 %454 }
  0xa4   : > { %v2732_v21 = vpop.permute.xlu1 %499 }
  0xa5   : > { %v2734_v22 = vpop.permute.xlu0 %591 }
  0xa9   : > { %v2738_v23 = vpop.permute.xlu1 %545 }
  0xaa   : > { %v2740_v24 = vpop.permute.xlu0 %621 }
  0xae   : > { %v2742_v25 = vpop.permute.xlu1 %575 }
  0xaf   : > { %v2744_v26 = vpop.permute.xlu0 %683 }
  0xb3   : > { %v2746_v27 = vpop.permute.xlu1 %637 }
  0xb4   : > { %v2748_v28 = vpop.permute.xlu0 %713 }
  0xb8   : > { %v2750_v29 = vpop.permute.xlu1 %667 }
  0xb9   : > { %v2752_v30 = vpop.permute.xlu0 %775 }
  0xbd   : > { %v2754_v31 = vpop.permute.xlu1 %729 }
  0xbe   : > { %v2756_v32 = vpop.permute.xlu0 %805 }
  0xc2   : > { %v2758_v33 = vpop.permute.xlu1 %759 }
  0xc3   : > { %v440_v34 = vpop.permute.xlu0 %439 }
  0xc9   : > { %v2760_v35 = vpop.permute.xlu1 %821  ;;  %v484_v36 = vpop.permute.xlu0 %483 }
 0x11b   : > { %v341_v10 = vpop.f32.mrb[0].mxu0 }
 0x11c   : > { %v2656_v11 = vadd.f32 %v341_v10, %v263_v9  ;;  %v343_v12 = vpop.f32.mrb[1].mxu0 }
 0x11d   : > { %v2658_v13 = vadd.f32 %v343_v12, %v263_v9  ;;  %v2826_v12 = vrot.slane %v2259_v60, %v2771_v49 }
 0x11e   : > { %459 = vrot.lane.b32.xlu1 %v2656_v11, %s2495_s5  ;;  %v434_v61 = vmul.f32 %v432_v17, %v2656_v11 }
 0x11f   : > { %v422_v4 = vpop.f32.mrb[2].mxu0  ;;  %461 = vrot.lane.b32.xlu0 %v2658_v13, %s2495_s5  ;;  %v435_v62 = vmul.f32 %v432_v17, %v2658_v13 }
 0x120   : > { %v424_v14 = vpop.f32.mrb[3].mxu0  ;;  %v2680_v15 = vadd.f32 %v422_v4, %v351_v2  ;;  %v2832_v4 = vrot.slane %v2259_v60, %v2774_v50  ;;  %v442_v17 = vadd.f32 %v440_v34, %v434_v61 }
 0x121   : > { %v2694_v16 = vadd.f32 %v424_v14, %v351_v2  ;;  %v2836_v14 = vrot.slane %v2256_v3, %v2771_v49  ;;  %v2839_v2 = vrot.slane %v2256_v3, %v2774_v50 }
 0x122   : > { %506 = vrot.lane.b32.xlu1 %v2656_v11, %s2496_s6 }
 0x123   : > { %554 = vrot.lane.b32.xlu0 %v2658_v13, %s2497_s7 }
 0x126   : > { %552 = vrot.lane.b32.xlu1 %v2656_v11, %s2497_s7 }
 0x127   : > { %646 = vrot.lane.b32.xlu0 %v2658_v13, %s2498_s8 }
 0x12a   : > { %598 = vrot.lane.b32.xlu1 %v2656_v11, %s2499_s9 }
 0x12b   : > { %738 = vrot.lane.b32.xlu0 %v2658_v13, %s2500_s10 }
 0x12e   : > { %644 = vrot.lane.b32.xlu1 %v2656_v11, %s2498_s8 }
 0x12f   : > { %784 = vrot.lane.b32.xlu0 %v2658_v13, %s2501_s11 }
 0x132   : > { %690 = vrot.lane.b32.xlu1 %v2656_v11, %s2502_s12 }
 0x133   : > { %536 = vrot.lane.b32.xlu0 %v2680_v15, %s2496_s6 }
 0x136   : > { %736 = vrot.lane.b32.xlu1 %v2656_v11, %s2500_s10 }
 0x137   : > { %628 = vrot.lane.b32.xlu0 %v2680_v15, %s2499_s9 }
 0x13a   : > { %782 = vrot.lane.b32.xlu1 %v2656_v11, %s2501_s11 }
 0x13b   : > { %720 = vrot.lane.b32.xlu0 %v2680_v15, %s2502_s12 }
 0x13e   : > { %508 = vrot.lane.b32.xlu1 %v2658_v13, %s2496_s6 }
 0x13f   : > { %492 = vrot.lane.b32.xlu0 %v2694_v16, %s2495_s5 }
 0x142   : > { %600 = vrot.lane.b32.xlu1 %v2658_v13, %s2499_s9 }
 0x143   : > { %584 = vrot.lane.b32.xlu0 %v2694_v16, %s2497_s7 }
 0x146   : > { %692 = vrot.lane.b32.xlu1 %v2658_v13, %s2502_s12  ;;  %v2258_v13 = vld [vmem:[%s3277_s3 + $0x3] ss:$8 sm:$0x3] }
 0x147   : > { %676 = vrot.lane.b32.xlu0 %v2694_v16, %s2498_s8 }
 0x14a   : > { %490 = vrot.lane.b32.xlu1 %v2680_v15, %s2495_s5 }
 0x14b   : > { %768 = vrot.lane.b32.xlu0 %v2694_v16, %s2500_s10 }
 0x14e   : > { %582 = vrot.lane.b32.xlu1 %v2680_v15, %s2497_s7 }
 0x14f   : > { %814 = vrot.lane.b32.xlu0 %v2694_v16, %s2501_s11 }
 0x152   : > { %674 = vrot.lane.b32.xlu1 %v2680_v15, %s2498_s8 }
 0x156   : > { %766 = vrot.lane.b32.xlu1 %v2680_v15, %s2500_s10 }
 0x15a   : > { %538 = vrot.lane.b32.xlu1 %v2694_v16, %s2496_s6 }
 0x15e   : > { %630 = vrot.lane.b32.xlu1 %v2694_v16, %s2499_s9 }
 0x162   : > { %722 = vrot.lane.b32.xlu1 %v2694_v16, %s2502_s12 }
 0x166   : > { %812 = vrot.lane.b32.xlu1 %v2680_v15, %s2501_s11 }
 0x190   : > { %v460_v37 = vpop.permute.xlu1 %459 }
 0x191   : > { %v462_v38 = vpop.permute.xlu0 %461 }
 0x192   : > { %v466_v56 = vsel %vm465_vm2, %v460_v37, %v462_v38  ;;  %v467_v57 = vsel %vm465_vm2, %v462_v38, %v460_v37  ;;  %v443_v37 = vadd.f32 %v440_v34, %v435_v62 }
 0x193   : > { %v480_v63 = vmul.f32 %v2785_v54, %v467_v57  ;;  %v481_v1 = vmul.f32 %v2788_v55, %v466_v56  ;;  %v2845_v56 = vrot.slane %v2258_v13, %v2771_v49  ;;  %v2260_v57 = vld [vmem:[%s3277_s3 + $0x6] ss:$8 sm:$0x3] }
 0x194   : > { %v507_v39 = vpop.permute.xlu1 %506 }
 0x195   : > { %v555_v40 = vpop.permute.xlu0 %554  ;;  %v486_v38 = vmul.f32 %v484_v36, %v480_v63 }
 0x197   : > { %v488_v3 = vadd.f32 %v486_v38, %v442_v17 }
 0x198   : > { %v553_v41 = vpop.permute.xlu1 %552 }
 0x199   : > { %v647_v42 = vpop.permute.xlu0 %646  ;;  %v557_v10 = vsel %vm556_vm3, %v553_v41, %v555_v40  ;;  %v558_v11 = vsel %vm556_vm3, %v555_v40, %v553_v41  ;;  %v487_v40 = vmul.f32 %v484_v36, %v481_v1  ;;  %v2855_v36 = vrot.slane %v2258_v13, %v2774_v50 }
 0x19a   : > { %v572_v41 = vmul.f32 %v2811_v5, %v558_v11  ;;  %v573_v43 = vmul.f32 %v2814_v7, %v557_v10  ;;  %v2870_v11 = vrot.slane %v2260_v57, %v2774_v50 }
 0x19b   : > { %v489_v10 = vadd.f32 %v487_v40, %v443_v37 }
 0x19c   : > { %v2762_v44 = vpop.permute.xlu1 %598  ;;  %v578_v13 = vmul.f32 %v2742_v25, %v572_v41 }
 0x19d   : > { %v2766_v46 = vpop.permute.xlu0 %738 }
 0x1a0   : > { %v645_v47 = vpop.permute.xlu1 %644 }
 0x1a1   : > { %v2782_v53 = vpop.permute.xlu0 %784  ;;  %v649_v60 = vsel %vm648_vm4, %v645_v47, %v647_v42  ;;  %v650_v61 = vsel %vm648_vm4, %v647_v42, %v645_v47 }
 0x1a2   : > { %v665_v17 = vmul.f32 %v2832_v4, %v650_v61 }
 0x1a4   : > { %v2779_v52 = vpop.permute.xlu1 %690  ;;  %v671_v6 = vmul.f32 %v2750_v29, %v665_v17 }
 0x1a5   : > { %v2816_v8 = vpop.permute.xlu0 %536 }
 0x1a8   : > { %v2794_v58 = vpop.permute.xlu1 %736 }
 0x1a9   : > { %v2862_v62 = vpop.permute.xlu0 %628 }
 0x1ac   : > { %v2818_v9 = vpop.permute.xlu1 %782 }
 0x1b0   : > { %v509_v51 = vpop.permute.xlu1 %508 }
 0x1b1   : > { %v511_v59 = vsel %vm510_vm5, %v507_v39, %v509_v51  ;;  %v512_v34 = vsel %vm510_vm5, %v509_v51, %v507_v39  ;;  %v2867_v39 = vrot.slane %v2260_v57, %v2771_v49  ;;  %v579_v51 = vmul.f32 %v2742_v25, %v573_v43 }
 0x1b2   : > { %v526_v63 = vmul.f32 %v2836_v14, %v512_v34  ;;  %v527_v1 = vmul.f32 %v2839_v2, %v511_v59  ;;  %v664_v34 = vmul.f32 %v2826_v12, %v649_v60 }
 0x1b4   : > { %v532_v42 = vmul.f32 %v2724_v19, %v526_v63  ;;  %v533_v47 = vmul.f32 %v2724_v19, %v527_v1  ;;  %v601_v0 = vpop.permute.xlu1 %600  ;;  %v2886_v19 = vpop.permute.xlu0 %720  ;;  %v670_v1 = vmul.f32 %v2750_v29, %v664_v34 }
 0x1b5   : > { %v603_v37 = vsel %vm602_vm6, %v2762_v44, %v601_v0  ;;  %v604_v38 = vsel %vm602_vm6, %v601_v0, %v2762_v44 }
 0x1b6   : > { %v534_v40 = vadd.f32 %v532_v42, %v488_v3  ;;  %v535_v41 = vadd.f32 %v533_v47, %v489_v10  ;;  %v618_v25 = vmul.f32 %v2845_v56, %v604_v38  ;;  %v619_v43 = vmul.f32 %v2855_v36, %v603_v37 }
 0x1b8   : > { %v581_v57 = vadd.f32 %v579_v51, %v535_v41  ;;  %v580_v59 = vadd.f32 %v578_v13, %v534_v40  ;;  %v624_v60 = vmul.f32 %v2740_v24, %v618_v25  ;;  %v625_v61 = vmul.f32 %v2740_v24, %v619_v43  ;;  %v693_v63 = vpop.permute.xlu1 %692  ;;  %v493_v17 = vpop.permute.xlu0 %492 }
 0x1b9   : > { %v695_v0 = vsel %vm694_vm7, %v2779_v52, %v693_v63  ;;  %v696_v44 = vsel %vm694_vm7, %v693_v63, %v2779_v52  ;;  %v2261_v52 = vld [vmem:[%s3277_s3 + $0x7] ss:$8 sm:$0x3]  ;;  %v449_v43 = vmul.f32 %v2720_v18, %v2680_v15  ;;  %v742_v63 = vsel %vm740_vm8, %v2766_v46, %v2794_v58 }
 0x1ba   : > { %v626_v3 = vadd.f32 %v624_v60, %v580_v59  ;;  %v627_v10 = vadd.f32 %v625_v61, %v581_v57  ;;  %v710_v13 = vmul.f32 %v2867_v39, %v695_v0  ;;  %v711_v51 = vmul.f32 %v2870_v11, %v696_v44 }
 0x1bb   : > { %v450_v57 = vmul.f32 %v2720_v18, %v2694_v16  ;;  %v2919_v59 = vrot.slane %v2261_v52, %v2771_v49  ;;  %v2922_v60 = vrot.slane %v2261_v52, %v2774_v50  ;;  %v741_v61 = vsel %vm740_vm8, %v2794_v58, %v2766_v46  ;;  %v2262_v46 = vld [vmem:[%s3277_s3 + $0x10] ss:$8 sm:$0x3] }
 0x1bc   : > { %v673_v24 = vadd.f32 %v671_v6, %v627_v10  ;;  %v672_v42 = vadd.f32 %v670_v1, %v626_v3  ;;  %v716_v47 = vmul.f32 %v2748_v28, %v710_v13  ;;  %v717_v29 = vmul.f32 %v2748_v28, %v711_v51  ;;  %v491_v34 = vpop.permute.xlu1 %490  ;;  %v585_v41 = vpop.permute.xlu0 %584 }
 0x1bd   : > { %v494_v6 = vsel %vm465_vm2, %v491_v34, %v493_v17  ;;  %v495_v28 = vsel %vm465_vm2, %v493_v17, %v491_v34  ;;  %v457_v44 = vadd.f32 %v2726_v20, %v449_v43  ;;  %v756_v3 = vmul.f32 %v2919_v59, %v741_v61 }
 0x1be   : > { %v2902_v37 = vadd.f32 %v716_v47, %v672_v42  ;;  %v2904_v38 = vadd.f32 %v717_v29, %v673_v24  ;;  %v496_v15 = vmul.f32 %v495_v28, %v2785_v54  ;;  %v497_v16 = vmul.f32 %v494_v6, %v2788_v55 }
 0x1bf   : > { %v757_v10 = vmul.f32 %v2922_v60, %v742_v63  ;;  %v458_v13 = vadd.f32 %v2726_v20, %v450_v57  ;;  %v2958_v20 = vrot.slane %v2262_v46, %v2774_v50 }
 0x1c0   : > { %v583_v40 = vpop.permute.xlu1 %582  ;;  %v677_v58 = vpop.permute.xlu0 %676  ;;  %v502_v51 = vmul.f32 %v2732_v21, %v496_v15  ;;  %v503_v24 = vmul.f32 %v2732_v21, %v497_v16 }
 0x1c1   : > { %v586_v1 = vsel %vm556_vm3, %v583_v40, %v585_v41  ;;  %v587_v0 = vsel %vm556_vm3, %v585_v41, %v583_v40  ;;  %v2955_v40 = vrot.slane %v2262_v46, %v2771_v49  ;;  %v762_v41 = vmul.f32 %v2758_v33, %v756_v3 }
 0x1c2   : > { %v588_v42 = vmul.f32 %v587_v0, %v2811_v5  ;;  %v589_v47 = vmul.f32 %v586_v1, %v2814_v7  ;;  %v763_v6 = vmul.f32 %v2758_v33, %v757_v10  ;;  %v505_v43 = vadd.f32 %v503_v24, %v458_v13 }
 0x1c4   : > { %v675_v25 = vpop.permute.xlu1 %674  ;;  %v769_v61 = vpop.permute.xlu0 %768  ;;  %v594_v63 = vmul.f32 %v2734_v22, %v588_v42  ;;  %v595_v15 = vmul.f32 %v2734_v22, %v589_v47 }
 0x1c5   : > { %v678_v29 = vsel %vm648_vm4, %v675_v25, %v677_v58  ;;  %v679_v34 = vsel %vm648_vm4, %v677_v58, %v675_v25  ;;  %v504_v25 = vadd.f32 %v502_v51, %v457_v44  ;;  %v787_v58 = vsel %vm786_vm9, %v2818_v9, %v2782_v53 }
 0x1c6   : > { %v680_v50 = vmul.f32 %v678_v29, %v2826_v12  ;;  %v681_v57 = vmul.f32 %v679_v34, %v2832_v4 }
 0x1c8   : > { %v767_v18 = vpop.permute.xlu1 %766  ;;  %v686_v13 = vmul.f32 %v2744_v26, %v680_v50  ;;  %v815_v50 = vpop.permute.xlu0 %814 }
 0x1c9   : > { %v770_v1 = vsel %vm740_vm8, %v767_v18, %v769_v61  ;;  %v771_v0 = vsel %vm740_vm8, %v769_v61, %v767_v18  ;;  %v788_v18 = vsel %vm786_vm9, %v2782_v53, %v2818_v9 }
 0x1ca   : > { %v772_v34 = vmul.f32 %v770_v1, %v2919_v59 }
 0x1cc   : > { %v539_v17 = vpop.permute.xlu1 %538 }
 0x1cd   : > { %v540_v21 = vsel %vm510_vm5, %v2816_v8, %v539_v17  ;;  %v541_v52 = vsel %vm510_vm5, %v539_v17, %v2816_v8  ;;  %v773_v17 = vmul.f32 %v771_v0, %v2922_v60 }
 0x1ce   : > { %v542_v28 = vmul.f32 %v541_v52, %v2836_v14  ;;  %v543_v49 = vmul.f32 %v540_v21, %v2839_v2 }
 0x1d0   : > { %v548_v8 = vmul.f32 %v2738_v23, %v542_v28  ;;  %v549_v16 = vmul.f32 %v2738_v23, %v543_v49  ;;  %v631_v33 = vpop.permute.xlu1 %630  ;;  %v803_v49 = vmul.f32 %v2958_v20, %v788_v18 }
 0x1d1   : > { %v632_v44 = vsel %vm602_vm6, %v2862_v62, %v631_v33  ;;  %v633_v3 = vsel %vm602_vm6, %v631_v33, %v2862_v62  ;;  %v687_v62 = vmul.f32 %v2744_v26, %v681_v57 }
 0x1d2   : > { %v550_v22 = vadd.f32 %v548_v8, %v504_v25  ;;  %v551_v10 = vadd.f32 %v549_v16, %v505_v43  ;;  %v634_v46 = vmul.f32 %v633_v3, %v2845_v56  ;;  %v635_v23 = vmul.f32 %v632_v44, %v2855_v36 }
 0x1d3   : > { %v764_v25 = vadd.f32 %v762_v41, %v2902_v37  ;;  %v765_v43 = vadd.f32 %v763_v6, %v2904_v38  ;;  %v778_v8 = vmul.f32 %v2752_v30, %v772_v34  ;;  %v779_v16 = vmul.f32 %v2752_v30, %v773_v17 }
 0x1d4   : > { %v596_v51 = vadd.f32 %v594_v63, %v550_v22  ;;  %v597_v24 = vadd.f32 %v595_v15, %v551_v10  ;;  %v640_v42 = vmul.f32 %v2746_v27, %v634_v46  ;;  %v641_v47 = vmul.f32 %v2746_v27, %v635_v23  ;;  %v723_v29 = vpop.permute.xlu1 %722 }
 0x1d5   : > { %v724_v21 = vsel %vm694_vm7, %v2886_v19, %v723_v29  ;;  %v725_v53 = vsel %vm694_vm7, %v723_v29, %v2886_v19  ;;  %v802_v27 = vmul.f32 %v2955_v40, %v787_v58  ;;  %v838_v29 = vld [vmem:[%s3275_s1 + $0x10] sm:$0xf] }
 0x1d6   : > { %v642_v26 = vadd.f32 %v640_v42, %v596_v51  ;;  %v643_v9 = vadd.f32 %v641_v47, %v597_v24  ;;  %v726_v52 = vmul.f32 %v724_v21, %v2867_v39  ;;  %v727_v28 = vmul.f32 %v725_v53, %v2870_v11  ;;  %v1008_v53 = vld [vmem:[%s3275_s1 + $0x14] sm:$0xf] }
 0x1d7   : > { %v808_v0 = vmul.f32 %v2756_v32, %v802_v27 }
 0x1d8   : > { %v688_v57 = vadd.f32 %v686_v13, %v642_v26  ;;  %v689_v61 = vadd.f32 %v687_v62, %v643_v9  ;;  %v732_v63 = vmul.f32 %v2754_v31, %v726_v52  ;;  %v733_v19 = vmul.f32 %v2754_v31, %v727_v28  ;;  %v813_v15 = vpop.permute.xlu1 %812  ;;  %v1082_v26 = vld [vmem:[%s3275_s1 + $0x18] sm:$0xf]  ;;  %v1169_v9 = vld [vmem:[%s3275_s1 + $0x1c] sm:$0xf]  ;;  %v1337_v52 = vld [vmem:[%s3275_s1 + $0x20] sm:$0xf] }
 0x1d9   : > { %v816_v33 = vsel %vm786_vm9, %v813_v15, %v815_v50  ;;  %v817_v37 = vsel %vm786_vm9, %v815_v50, %v813_v15  ;;  %v809_v31 = vmul.f32 %v2756_v32, %v803_v49  ;;  %v810_v10 = vadd.f32 %v808_v0, %v764_v25  ;;  %v922_v25 = vld [vmem:[%s3276_s2 + $0x14] sm:$0xf] }
 0x1da   : > { %v734_v41 = vadd.f32 %v732_v63, %v688_v57  ;;  %v735_v38 = vadd.f32 %v733_v19, %v689_v61  ;;  %v818_v6 = vmul.f32 %v816_v33, %v2955_v40  ;;  %v819_v1 = vmul.f32 %v817_v37, %v2958_v20  ;;  %v3286_v33 = vld [vmem:[#allocation5_spill] sm:$0xff] }
 0x1db   : > { %v811_v46 = vadd.f32 %v809_v31, %v765_v43  ;;  %v3285_v32 = vmov 0.0   ;;  %v2504_v43 = vmov 839922192  }
 0x1dc   : > { %v824_v44 = vmul.f32 %v2760_v35, %v818_v6  ;;  %v825_v30 = vmul.f32 %v2760_v35, %v819_v1  ;;  %v780_v3 = vadd.f32 %v778_v8, %v734_v41  ;;  %v781_v22 = vadd.f32 %v779_v16, %v735_v38  ;;  %2315 = vmatprep.mubr.msk.f32.mxu0 %vm2503_vm10, %v3285_v32  ;;  %v837_v35 = vld [vmem:[%s3276_s2 + $0x10] sm:$0xf] }
 0x1dd   : > { %v1014_v50 = vunpack.c.l.s4 %v2504_v43 }
 0x1de   : > { %v826_v23 = vadd.f32 %v824_v44, %v780_v3  ;;  %v827_v58 = vadd.f32 %v825_v30, %v781_v22 }
 0x1df   : > { %v1015_v57 = vunpack.c.0.s8 %v1014_v50 }
 0x1e0   : > { %v828_v18 = vmul.f32 %v826_v23, %v810_v10  ;;  %v829_v13 = vmul.f32 %v827_v58, %v811_v46 }
 0x1e1   : > { %v3060_v61 = vsub.s32 %v1015_v57, %v2764_v45 }
 0x1e2   : > { %v830_v62 = vsel %vm200_vm0, %v828_v18, 0.0  ;;  %v831_v51 = vsel %vm200_vm0, %v829_v13, 0.0 }
 0x1e3   : > { %v832_v24 = vadd.f32 %v831_v51, %v830_v62 }
 0x1e5   : > { %833 = vadd.xlane.f32.xlu1 %v832_v24 }
 0x272   : > { %v834_v42 = vpop.xlane.xlu1 %833 }
 0x273   : > { %v836_v47 = vmul.f32 0.00390625, %v834_v42 }
 0x275   : > { %2314 = vmatpush3.msk.msra.mxu0 %vm200_vm0, %v836_v47 }
 0x276   : > { %2316 = vmatmul.mubr.msk.f32.vlgmr.msra.gmra.mrb[4].mxu0 %vm267_vm1, %v837_v35 }
 0x277   : > { %996 = vmatprep.mubr.f32.mxu0 %v3285_v32 }
 0x349   : > { %v911_v34 = vpop.f32.mrb[4].mxu0 }
 0x34a   : > { %v912_v17 = vadd.f32 %v911_v34, %v838_v29  ;;  %v2317_v21 = vpop.f32.mrb[5].mxu0 }
 0x34c   : > { %917 = vperm.xlu0 %2409, %v912_v17  }
 0x350   : > { %1011 = vperm.xlu0 %2409, %v1008_v53  }
 0x354   : > { %1085 = vperm.xlu0 %2409, %v1082_v26  }
 0x358   : > { %1172 = vperm.xlu0 %2409, %v1169_v9  }
 0x35c   : > { %1340 = vperm.xlu0 %2409, %v1337_v52  }
 0x3cb   : > { %v918_v28 = vpop.permute.xlu0 %917 }
 0x3cc   : > { %v920_v27 = vmul.f32 %v918_v28, %v828_v18  ;;  %v921_v49 = vmul.f32 %v918_v28, %v829_v13 }
 0x3ce   : > { %2265 = vmatprep.subr.msk.mxu0 %vm200_vm0, %v921_v49 }
 0x3cf   : > { %2266 = vmatpush1.msk.msra.mxu0 %vm200_vm0, %v920_v27  ;;  %v1012_v19 = vpop.permute.xlu0 %1011 }
 0x3d0   : > { %2267 = vmatmul.mubr.msk.f32.vlgmr.msra.gmra.mrb[6].mxu0 %vm267_vm1, %v922_v25  ;;  %v1019_v16 = vrot.slane %v1012_v19, %v3060_v61 }
 0x3d1   : > { %1161 = vmatprep.mubr.f32.mxu0 %v3285_v32 }
 0x4a3   : > { %v998_v63 = vpop.f32.mrb[6].mxu0 }
 0x4a4   : > { %v1000_v15 = vpop.f32.mrb[7].mxu0 }
 0x4a5   : > { %v1005_v8 = vcombine.low %v998_v63, %v1000_v15 }
 0x4a7   : > { %v1007_v37 = vadd.f32 %v1005_v8, %v3286_v33 }
 0x4a9   : > { %v3064_v41 = vadd.f32 %v1019_v16, %v1007_v37 }
 0x4ab   : > { %v1023_v38 = vcombine.high %v3064_v41, %v3064_v41  ;;  %v1025_v6 = vsel %vm200_vm0, %v3064_v41, 0.0  ;;  %v1041_v45 = vmul.f32 %v3064_v41, %v3064_v41 }
 0x4ac   : > { %v1026_v1 = vrot.slane %v1025_v6, 4 }
 0x4ad   : > { %v1032_v0 = vsel %vm200_vm0, %v1023_v38, 0.0  ;;  %v1043_v31 = vcombine.high %v1041_v45, %v1041_v45  ;;  %v1045_v44 = vsel %vm200_vm0, %v1041_v45, 0.0 }
 0x4ae   : > { %v1027_v30 = vadd.f32 %v1026_v1, %v1025_v6  ;;  %v1033_v3 = vrot.slane %v1032_v0, 4  ;;  %v1046_v22 = vrot.slane %v1045_v44, 4 }
 0x4af   : > { %v1052_v10 = vsel %vm200_vm0, %v1043_v31, 0.0 }
 0x4b0   : > { %v1028_v46 = vrot.slane %v1027_v30, 2  ;;  %v1034_v23 = vadd.f32 %v1033_v3, %v1032_v0  ;;  %v1047_v58 = vadd.f32 %v1046_v22, %v1045_v44  ;;  %v1053_v18 = vrot.slane %v1052_v10, 4  ;;  %v1081_v44 = vld [vmem:[%s3276_s2 + $0x18] sm:$0xf]  ;;  %v1086_v3 = vpop.permute.xlu0 %1085 }
 0x4b2   : > { %v1029_v13 = vadd.f32 %v1028_v46, %v1027_v30  ;;  %v1035_v62 = vrot.slane %v1034_v23, 2  ;;  %v1048_v51 = vrot.slane %v1047_v58, 2  ;;  %v1054_v24 = vadd.f32 %v1053_v18, %v1052_v10  ;;  %v1168_v30 = vld [vmem:[%s3276_s2 + $0x1c] sm:$0xf] }
 0x4b4   : > { %v1049_v42 = vadd.f32 %v1048_v51, %v1047_v58  ;;  %v1055_v47 = vrot.slane %v1054_v24, 2  ;;  %v1030_v35 = vrot.slane %v1029_v13, 1  ;;  %v1036_v29 = vadd.f32 %v1035_v62, %v1034_v23  ;;  %v1173_v46 = vpop.permute.xlu0 %1172 }
 0x4b6   : > { %v1050_v34 = vrot.slane %v1049_v42, 1  ;;  %v1056_v17 = vadd.f32 %v1055_v47, %v1054_v24  ;;  %v1031_v21 = vadd.f32 %v1030_v35, %v1029_v13  ;;  %v1037_v53 = vrot.slane %v1036_v29, 1  ;;  %v1251_v47 = vld [vmem:[%s3276_s2 + $0x20] sm:$0xf] }
 0x4b8   : > { %v1051_v26 = vadd.f32 %v1050_v34, %v1049_v42  ;;  %v1057_v9 = vrot.slane %v1056_v17, 1  ;;  %v1038_v52 = vadd.f32 %v1037_v53, %v1036_v29  ;;  %v1039_v28 = vmul.f32 0.25, %v1031_v21  ;;  %v1341_v29 = vpop.permute.xlu0 %1340 }
 0x4b9   : > { %v1348_v21 = vrot.slane %v1341_v29, %v3060_v61  ;;  %v2159_v61 = vld [vmem:[%s3275_s1 + $0x24] sm:$0xff] }
 0x4ba   : > { %v1040_v27 = vmul.f32 0.25, %v1038_v52  ;;  %v1058_v49 = vadd.f32 %v1057_v9, %v1056_v17  ;;  %v1059_v25 = vmul.f32 0.25, %v1051_v26  ;;  %v1061_v43 = vmul.f32 %v1039_v28, %v1039_v28  ;;  %v1355_v52 = vld [vmem:[%s3276_s2 + $0x44] sm:$0xff] }
 0x4bc   : > { %v1060_v50 = vmul.f32 0.25, %v1058_v49  ;;  %v1062_v57 = vmul.f32 %v1040_v27, %v1040_v27  ;;  %v1063_v63 = vsub.f32 %v1059_v25, %v1061_v43  ;;  %v1069_v37 = vcombine.low %v1039_v28, %v1040_v27 }
 0x4be   : > { %v1064_v19 = vsub.f32 %v1060_v50, %v1062_v57  ;;  %v1065_v15 = vmax.f32 %v1063_v63, 0.0  ;;  %v1071_v45 = vsub.f32 %v3064_v41, %v1069_v37  ;;  %v1352_v50 = vld [vmem:[%s3276_s2 + $0x2c] sm:$0xff] }
 0x4c0   : > { %v1066_v8 = vmax.f32 %v1064_v19, 0.0  ;;  %v1072_v16 = vadd.f32 1e-06, %v1065_v15 }
 0x4c2   : > { %v1073_v33 = vadd.f32 1e-06, %v1066_v8  ;;  %2417 = vrsqrt.f32 %v1072_v16  ;;  %v1353_v16 = vld [vmem:[%s3276_s2 + $0x34] sm:$0xff] }
 0x4c4   : > { %2419 = vrsqrt.f32 %v1073_v33 }
 0x4cc   : > { %v2418_v38 = vpop.eup %2417 }
 0x4ce   : > { %v2420_v6 = vpop.eup %2419 }
 0x4cf   : > { %v1078_v1 = vcombine.low %v2418_v38, %v2420_v6 }
 0x4d1   : > { %v1080_v0 = vmul.f32 %v1078_v1, %v1071_v45  ;;  %v1354_v1 = vld [vmem:[%s3276_s2 + $0x3c] sm:$0xff] }
 0x4d3   : > { %v1089_v31 = vcombine.high %v1080_v0, %v1080_v0 }
 0x4d5   : > { %2268 = vmatprep.subr.msk.mxu0 %vm200_vm0, %v1089_v31 }
 0x4d6   : > { %2269 = vmatpush1.msk.msra.mxu0 %vm200_vm0, %v1080_v0 }
 0x4d7   : > { %2270 = vmatmul.mubr.msk.f32.vlgmr.msra.gmra.mrb[8].mxu0 %vm267_vm1, %v1081_v44  ;;  %2271 = vmatprep.subr.msk.mxu0 %vm200_vm0, %v1089_v31 }
 0x4d8   : > { %2272 = vmatpush1.msk.msra.mxu0 %vm200_vm0, %v1080_v0  ;;  %1242 = vmatprep.mubr.f32.mxu0 %v3285_v32 }
 0x4db   : > { %2273 = vmatmul.mubr.msk.f32.vlgmr.msra.gmra.mrb[10].mxu0 %vm267_vm1, %v1168_v30 }
 0x4dc   : > { %1325 = vmatprep.mubr.f32.mxu0 %v3285_v32 }
 0x5aa   : > { %v1163_v22 = vpop.f32.mrb[8].mxu0 }
 0x5ab   : > { %v1165_v10 = vpop.f32.mrb[9].mxu0  ;;  %v1164_v58 = vadd.f32 %v1163_v22, %v1086_v3 }
 0x5ac   : > { %v1166_v62 = vadd.f32 %v1165_v10, %v1086_v3 }
 0x5ae   : > { %v1244_v23 = vpop.f32.mrb[10].mxu0 }
 0x5af   : > { %v1245_v18 = vadd.f32 %v1244_v23, %v1173_v46  ;;  %v1246_v13 = vpop.f32.mrb[11].mxu0 }
 0x5b0   : > { %v1247_v51 = vadd.f32 %v1246_v13, %v1173_v46 }
 0x5b1   : > { %v1249_v24 = vmul.f32 %v1245_v18, %v1164_v58 }
 0x5b2   : > { %v1250_v42 = vmul.f32 %v1247_v51, %v1166_v62 }
 0x5b4   : > { %2274 = vmatprep.subr.msk.mxu0 %vm200_vm0, %v1250_v42  ;;  %v1357_v42 = vld [vmem:[%s3276_s2 + $0x54] sm:$0xff] }
 0x5b5   : > { %2275 = vmatpush1.msk.msra.mxu0 %vm200_vm0, %v1249_v24 }
 0x5b6   : > { %2276 = vmatmul.mubr.msk.f32.vlgmr.msra.gmra.mrb[12].mxu0 %vm267_vm1, %v1251_v47  ;;  %v1351_v47 = vld [vmem:[%s3276_s2 + $0x24] sm:$0xff] }
 0x5b7   : > { %1444 = vmatprep.mubr.f32.mxu0 %v3285_v32 }
 0x689   : > { %v1327_v35 = vpop.f32.mrb[12].mxu0 }
 0x68a   : > { %v1329_v34 = vpop.f32.mrb[13].mxu0 }
 0x68b   : > { %v1334_v17 = vcombine.low %v1327_v35, %v1329_v34 }
 0x68d   : > { %v1336_v53 = vadd.f32 %v1334_v17, %v3064_v41 }
 0x68f   : > { %v1350_v26 = vadd.f32 %v1348_v21, %v1336_v53  ;;  %v1359_v21 = vld [vmem:[%s3276_s2 + $0x64] sm:$0xff] }
 0x691   : > { %1529 = vrot.lane.b32.xlu0 %v1350_v26, %s2496_s6  ;;  %v1361_v9 = vcombine.high %v1350_v26, %v1350_v26 }
 0x693   : > { %1621 = vrot.lane.b32.xlu1 %v1361_v9, %s2497_s7  ;;  %2280 = vmatprep.subr.msk.mxu1 %vm200_vm0, %v1361_v9 }
 0x694   : > { %2281 = vmatpush1.msk.msra.mxu1 %vm200_vm0, %v1350_v26 }
 0x695   : > { %1531 = vrot.lane.b32.xlu0 %v1361_v9, %s2496_s6  ;;  %2282 = vmatmul.mubr.msk.f32.vlgmr.msra.gmra.mrb[0].mxu1 %vm267_vm1, %v1355_v52 }
 0x696   : > { %1610 = vmatprep.mubr.f32.mxu1 %v3285_v32 }
 0x697   : > { %1889 = vrot.lane.b32.xlu1 %v1350_v26, %s2502_s12 }
 0x699   : > { %1619 = vrot.lane.b32.xlu0 %v1350_v26, %s2497_s7  ;;  %s188_s7 = sand.u32 1, %s2475_s16  }
 0x69a   : > { %s2170_s22 = scalar_lea.sflag [#allocation3], %s188_s7 }
 0x69b   : > { %1979 = vrot.lane.b32.xlu1 %v1350_v26, %s2500_s10 }
 0x69d   : > { %1709 = vrot.lane.b32.xlu0 %v1350_v26, %s2499_s9 }
 0x69f   : > { %1363 = vrot.lane.b32.xlu1 %v1350_v26, %s2495_s5 }
 0x6a1   : > { %1711 = vrot.lane.b32.xlu0 %v1361_v9, %s2499_s9 }
 0x6a3   : > { %2069 = vrot.lane.b32.xlu1 %v1350_v26, %s2501_s11 }
 0x6a5   : > { %1799 = vrot.lane.b32.xlu0 %v1350_v26, %s2498_s8 }
 0x6a7   : > { %2162 = vperm.xlu1 %2411, %v2159_v61  }
 0x6a9   : > { %1801 = vrot.lane.b32.xlu0 %v1361_v9, %s2498_s8  ;;  %s2310_s8 = sshll.u32 %s2552_s19, 8  ;;  %s2505_s19 = smov [#allocation2]  }
 0x6aa   : > { %s3232_s20 = scalar_lea.hbm %s3278_s4, %s2310_s8  ;;  %s2425_s27 = sshll.u32 %s2505_s19, 4  ;;  %s2426_s27 = int_to_ptr.vmem [resolvable:$false] %s2425_s27 }
 0x6ab   : > { %s2427_s28 = scalar_lea.vmem %s2426_s27, 512 }
 0x6ad   : > { %1891 = vrot.lane.b32.xlu0 %v1361_v9, %s2502_s12 }
 0x6b1   : > { %1981 = vrot.lane.b32.xlu0 %v1361_v9, %s2500_s10 }
 0x6b5   : > { %1365 = vrot.lane.b32.xlu0 %v1361_v9, %s2495_s5  ;;  %s2247_s5 = sshll.u32 %s188_s7, 4 }
 0x6b6   : > { %s190_s9 = scalar_lea.vmem [#allocation2], %s2247_s5 }
 0x6b7   : > { %s2184_s10 = sshll.u32 %s190_s9, 4  ;;  %s3234_s10 = int_to_ptr.vmem [resolvable:$true] %s2184_s10 }
 0x6b8   : > { %s2421_s23 = scalar_lea.vmem %s3234_s10, 256  ;;  %p2428_p0 = scmp.lt.s32.totalorder %s3234_s10, %s2426_s27 }
 0x6b9   : > { %2071 = vrot.lane.b32.xlu0 %v1361_v9, %s2501_s11  ;;  %p2422_p11 = scmp.ne.s32.totalorder %s3234_s10, %s2421_s23  ;;  %p2429_p1 = scmp.lt.s32.totalorder %s2427_s28, %s2421_s23 }
 0x6bb   : > { %p2423_p12 = pnand %p2422_p11, %p2569_p5  ;;  %p2430_p2 = por %p2429_p1, %p2428_p0 }
 0x6bd   : > { %p2424_p13 = pneg %p2423_p12 }
 0x6bf   : > { %p2431_p3 = pnand %p2430_p2, %p2424_p13 }
 0x703   : > { %v1530_v41 = vpop.permute.xlu0 %1529 }
 0x705   : > { %v1622_v57 = vpop.permute.xlu1 %1621 }
 0x707   : > { %v1532_v28 = vpop.permute.xlu0 %1531 }
 0x708   : > { %v1533_v27 = vsel %vm510_vm5, %v1530_v41, %v1532_v28  ;;  %v1534_v49 = vsel %vm510_vm5, %v1532_v28, %v1530_v41 }
 0x709   : > { %v1535_v25 = vmul.f32 %v1534_v49, %v2836_v14  ;;  %v1536_v43 = vmul.f32 %v1533_v27, %v2839_v2  ;;  %v1890_v45 = vpop.permute.xlu1 %1889 }
 0x70b   : > { %v1620_v63 = vpop.permute.xlu0 %1619  ;;  %2283 = vmatprep.subr.msk.mxu1 %vm200_vm0, %v1536_v43 }
 0x70c   : > { %v1623_v19 = vsel %vm556_vm3, %v1620_v63, %v1622_v57  ;;  %v1624_v15 = vsel %vm556_vm3, %v1622_v57, %v1620_v63  ;;  %2284 = vmatpush1.msk.msra.mxu1 %vm200_vm0, %v1535_v25 }
 0x70d   : > { %v1625_v14 = vmul.f32 %v1624_v15, %v2811_v5  ;;  %v1626_v2 = vmul.f32 %v1623_v19, %v2814_v7  ;;  %2285 = vmatmul.mubr.msk.f32.vlgmr.msra.gmra.mrb[0].mxu1 %vm267_vm1, %v1352_v50  ;;  %v1980_v30 = vpop.permute.xlu1 %1979 }
 0x70e   : > { %1700 = vmatprep.mubr.f32.mxu1 %v3285_v32 }
 0x70f   : > { %v1710_v8 = vpop.permute.xlu0 %1709  ;;  %2286 = vmatprep.subr.msk.mxu1 %vm200_vm0, %v1626_v2 }
 0x710   : > { %2287 = vmatpush1.msk.msra.mxu1 %vm200_vm0, %v1625_v14 }
 0x711   : > { %v1364_v18 = vpop.permute.xlu1 %1363 }
 0x713   : > { %v1712_v33 = vpop.permute.xlu0 %1711 }
 0x714   : > { %v1713_v37 = vsel %vm602_vm6, %v1710_v8, %v1712_v33  ;;  %v1714_v5 = vsel %vm602_vm6, %v1712_v33, %v1710_v8 }
 0x715   : > { %v1715_v7 = vmul.f32 %v1714_v5, %v2845_v56  ;;  %v1716_v38 = vmul.f32 %v1713_v37, %v2855_v36  ;;  %2288 = vmatmul.mubr.msk.f32.vlgmr.msra.gmra.mrb[0].mxu1 %vm267_vm1, %v1353_v16  ;;  %v2070_v35 = vpop.permute.xlu1 %2069 }
 0x716   : > { %1790 = vmatprep.mubr.f32.mxu1 %v3285_v32 }
 0x717   : > { %v1800_v6 = vpop.permute.xlu0 %1799  ;;  %2289 = vmatprep.subr.msk.mxu1 %vm200_vm0, %v1716_v38 }
 0x718   : > { %2290 = vmatpush1.msk.msra.mxu1 %vm200_vm0, %v1715_v7 }
 0x71b   : > { %v1802_v0 = vpop.permute.xlu0 %1801 }
 0x71c   : > { %v1803_v56 = vsel %vm648_vm4, %v1800_v6, %v1802_v0  ;;  %v1804_v36 = vsel %vm648_vm4, %v1802_v0, %v1800_v6 }
 0x71d   : > { %v1805_v31 = vmul.f32 %v1803_v56, %v2826_v12  ;;  %v1806_v44 = vmul.f32 %v1804_v36, %v2832_v4  ;;  %2291 = vmatmul.mubr.msk.f32.vlgmr.msra.gmra.mrb[0].mxu1 %vm267_vm1, %v1354_v1  ;;  %v1356_v4 = vld [vmem:[%s3276_s2 + $0x4c] sm:$0xff] }
 0x71e   : > { %1880 = vmatprep.mubr.f32.mxu1 %v3285_v32 }
 0x71f   : > { %v1892_v3 = vpop.permute.xlu0 %1891  ;;  %2292 = vmatprep.subr.msk.mxu1 %vm200_vm0, %v1806_v44 }
 0x720   : > { %v1894_v22 = vsel %vm694_vm7, %v1892_v3, %v1890_v45  ;;  %2293 = vmatpush1.msk.msra.mxu1 %vm200_vm0, %v1805_v31  ;;  %v1893_v10 = vsel %vm694_vm7, %v1890_v45, %v1892_v3 }
 0x721   : > { %v1896_v12 = vmul.f32 %v1894_v22, %v2870_v11  ;;  %v1895_v23 = vmul.f32 %v1893_v10, %v2867_v39 }
 0x723   : > { %v1982_v46 = vpop.permute.xlu0 %1981  ;;  %2295 = vmatprep.subr.msk.mxu1 %vm200_vm0, %v1896_v12 }
 0x724   : > { %v1984_v58 = vsel %vm740_vm8, %v1982_v46, %v1980_v30  ;;  %v1983_v51 = vsel %vm740_vm8, %v1980_v30, %v1982_v46 }
 0x725   : > { %v1986_v13 = vmul.f32 %v1984_v58, %v2922_v60  ;;  %2294 = vmatmul.mubr.msk.f32.vlgmr.msra.gmra.mrb[0].mxu1 %vm267_vm1, %v1356_v4  ;;  %v1985_v34 = vmul.f32 %v1983_v51, %v2919_v59  ;;  %v1358_v59 = vld [vmem:[%s3276_s2 + $0x5c] sm:$0xff] }
 0x726   : > { %2296 = vmatpush1.msk.msra.mxu1 %vm200_vm0, %v1895_v23  ;;  %1970 = vmatprep.mubr.f32.mxu1 %v3285_v32  ;;  %v2163_v9 = vpop.permute.xlu1 %2162 }
 0x727   : > { %v1366_v11 = vpop.permute.xlu0 %1365  ;;  %2298 = vmatprep.subr.msk.mxu1 %vm200_vm0, %v1986_v13 }
 0x728   : > { %v1367_v62 = vsel %vm465_vm2, %v1364_v18, %v1366_v11  ;;  %v1368_v39 = vsel %vm465_vm2, %v1366_v11, %v1364_v18 }
 0x729   : > { %v1369_v60 = vmul.f32 %v1368_v39, %v2785_v54  ;;  %v1370_v24 = vmul.f32 %v1367_v62, %v2788_v55 }
 0x72b   : > { %2277 = vmatprep.subr.msk.mxu0 %vm200_vm0, %v1370_v24  ;;  %v2072_v29 = vpop.permute.xlu0 %2071 }
 0x72c   : > { %v2074_v17 = vsel %vm786_vm9, %v2072_v29, %v2070_v35  ;;  %2278 = vmatpush1.msk.msra.mxu0 %vm200_vm0, %v1369_v60  ;;  %v2073_v55 = vsel %vm786_vm9, %v2070_v35, %v2072_v29 }
 0x72d   : > { %v2076_v54 = vmul.f32 %v2074_v17, %v2958_v20  ;;  %2297 = vmatmul.mubr.msk.f32.vlgmr.msra.gmra.mrb[0].mxu1 %vm267_vm1, %v1357_v42  ;;  %2279 = vmatmul.mubr.msk.f32.vlgmr.msra.gmra.mrb[14].mxu0 %vm267_vm1, %v1351_v47  ;;  %v2075_v20 = vmul.f32 %v2073_v55, %v2955_v40 }
 0x72e   : > { %2299 = vmatpush1.msk.msra.mxu1 %vm200_vm0, %v1985_v34  ;;  %2060 = vmatprep.mubr.f32.mxu1 %v3285_v32 }
 0x72f   : > { %2301 = vmatprep.subr.msk.mxu1 %vm200_vm0, %v2076_v54 }
 0x735   : > { %2300 = vmatmul.mubr.msk.f32.vlgmr.msra.gmra.mrb[0].mxu1 %vm267_vm1, %v1358_v59 }
 0x736   : > { %2302 = vmatpush1.msk.msra.mxu1 %vm200_vm0, %v2075_v20  ;;  %2150 = vmatprep.mubr.f32.mxu1 %v3285_v32 }
 0x73d   : > { %2303 = vmatmul.mubr.msk.f32.vlgmr.msra.gmra.mrb[0].mxu1 %vm267_vm1, %v1359_v21 }
 0x800   : > { %v1446_v48 = vpop.f32.mrb[14].mxu0 }
 0x801   : > { %v1448_v53 = vpop.f32.mrb[15].mxu0 }
 0x810   : > { %v2152_v26 = vpop.f32.mrb[0].mxu1 }
 0x811   : > { %v2318_v40 = vadd.f32 %v2152_v26, %v1446_v48  ;;  %v2154_v52 = vpop.f32.mrb[1].mxu1 }
 0x812   : > { %v2319_v61 = vadd.f32 %v2154_v52, %v1448_v53 }
 0x813   : > { %v2165_v32 = vadd.f32 %v2318_v40, %v2163_v9 }
 0x814   : > { %v2166_v41 = vadd.f32 %v2319_v61, %v2163_v9 }
 0x815   : > { %2167 = vst [vmem:[%s190_s9] sm:$0xff] %v2165_v32 }
 0x816   : > { %2168 = vst [vmem:[%s190_s9 + $0x8] sm:$0xff] %v2166_v41 }
 0x817   : > { %2434 = shalt.err (!%p2431_p3)
}
 0x818   : > { %s2435_s29 = scalar_lea.hbm %s3232_s20, 256  ;;  %s2439_s14 = scalar_lea.hbm %s3278_s4, 512 }
 0x819   : > { %p2436_p4 = scmp.ne.s32.totalorder %s3232_s20, %s2435_s29  ;;  %p2440_p9 = scmp.lt.u32.totalorder %s3232_s20, %s3278_s4 }
 0x81a   : > { %p2441_p10 = scmp.lt.u32.totalorder %s2439_s14, %s2435_s29  ;;  %p2443_p12 = scmp.lt.u32.totalorder %s2435_s29, %s3232_s20 }
 0x81b   : > { %p2437_p7 = pnand %p2436_p4, %p2569_p5 }
 0x81c   : > { %p2442_p11 = por %p2441_p10, %p2440_p9 }
 0x81d   : > { %p2438_p8 = pneg %p2437_p7 }
 0x81e   : > { %p2444_p13 = por %p2443_p12, %p2442_p11 }
 0x820   : > { %p2445_p0 = pnand %p2444_p13, %p2438_p8 }
 0x822   : > { %2448 = shalt.err (!%p2445_p0)
}
 0x823   : > { %2334 = dma.vmem_to_hbm [thread:$0]  (%p2569_p5), %s3234_s10, 256, %s3232_s20, %s2170_s22  }
 0x824 PF: > { %p2340_p1 = scmp.ge.s32.totalorder %s2483_s18, 2  ;;  %s2196_s5 = sand.u32 1, %s2471_s15  }
 0x825   : > { %s2197_s8 = scalar_lea.sflag [#allocation3], %s2196_s5 }
 0x826   : > { %p2337_p2 = pnand %p2340_p1, %p2573_p6 }
 0x828   : > { %2466 = dma.done.wait (!%p2337_p2), %s2197_s8, 256  }
 0x829   : > { %2468 = vsyncadd (!%p2337_p2), %s2197_s8, 4294967040  ;;  %p14_p3 = scmp.ge.s32.totalorder %s2556_s21, 4   ;;  %s3287_s15 = smov %s2475_s16 }
 0x82a   : > { %s3288_s16 = smov %s2479_s17  ;;  %s3289_s17 = smov %s2567_s24 }
 0x82b   : > { %s3290_s18 = smov %s2556_s21  ;;  %16 = sbr.rel (!%p14_p3) target bundleno = 3 (0x3), region = 78 }
 0x832   :  { %2202 = vsyncpa [#allocation3], 1 }
 0x833   :  { %2204 = vsyncpa [#allocation3 + $0x1], 1 }

</bundles_post_ra>
